<compile_context>
chip_gen: v5e
topology: v5e:2x2
jax: 0.10.0
libtpu: 0.0.40
codegen_flags: <defaults>
</compile_context>

<pallas_src>
import math

import jax
import jax.numpy as jnp
from jax import lax
from jax.experimental import pallas as pl
from jax.experimental.pallas import tpu as pltpu


# ----------------------------- model config ---------------------------------
B = 2            # batch
S = 16           # seq len
H = 128          # hidden_size
NH = 4           # num_attention_heads
HD = H // NH     # head_dim = 32
I = 256          # intermediate_size
EPS = 1e-5       # layer_norm_epsilon
ATT_SCALE = 1.0 / math.sqrt(HD)


# --------------------------- fused block kernel ------------------------------
def block_kernel(x_ref, norm1_ref, wqkv_ref, wo_ref, norm2_ref, w13_ref, w2_ref,
                 cos_ref, sin_ref, out_ref):
    x = x_ref[...]                                          # (S, H) fp32, one batch

    # ---- RMSNorm 1 (fp32) ---------------------------------------------------
    var = jnp.mean(x * x, axis=-1, keepdims=True)
    xn = x * lax.rsqrt(var + EPS) * norm1_ref[...]

    # ---- fused q/k/v projection (bf16 MXU, fp32 accumulation) ----------------
    qkv = jnp.dot(xn.astype(jnp.bfloat16), wqkv_ref[...],
                  preferred_element_type=jnp.float32)       # (S, 3H)
    q = qkv[:, :H]
    k = qkv[:, H:2 * H]
    v = qkv[:, 2 * H:]

    # ---- rotary embedding, applied full-width --------------------------------
    # q_rope = q*cos + rotate_half(q)*sin; the rotate-half sign is folded into
    # the host-built (pre-rolled) sin table. Lane-select mask built ONCE.
    cos = cos_ref[...]
    sin = sin_ref[...]
    lane = lax.broadcasted_iota(jnp.int32, (S, H), 1) % HD
    half = lane < (HD // 2)

    def rot_heads(t):
        # out[:, h*HD + j] = t[:, h*HD + (j - HD//2) mod HD] via two XLU rolls
        left = pltpu.roll(t, H - HD // 2, axis=1)           # picks t[:, i + HD//2]
        right = pltpu.roll(t, HD // 2, axis=1)              # picks t[:, i - HD//2]
        return jnp.where(half, left, right)

    q_rot = (q * cos + rot_heads(q * sin)) * ATT_SCALE      # softmax scale folded here
    k_rot = k * cos + rot_heads(k * sin)

    # ---- causal mask for this batch's (S, S) tile -----------------------------
    row = lax.broadcasted_iota(jnp.int32, (S, S), 0)
    col = lax.broadcasted_iota(jnp.int32, (S, S), 1)
    mask = jnp.where(row >= col, 0.0, -1e30)

    # ---- per-head attention: bf16 MXU operands, fp32 accumulation,
    #      head outputs stay in vregs (no VMEM scratch round-trip) -------------
    heads = []
    for h in range(NH):                                     # static unroll, NH=4
        sl = slice(h * HD, (h + 1) * HD)
        qh = q_rot[:, sl].astype(jnp.bfloat16)               # (S, HD)
        kh = k_rot[:, sl].astype(jnp.bfloat16)               # (S, HD)
        # contract on dim 1 of both operands -> no materialized transpose
        s = lax.dot_general(qh, kh,
                            dimension_numbers=(((1,), (1,)), ((), ())),
                            preferred_element_type=jnp.float32) + mask
        s = s - jnp.max(s, axis=-1, keepdims=True)
        p = jnp.exp(s)
        p = p * pl.reciprocal(jnp.sum(p, axis=-1, keepdims=True), approx=True)
        heads.append(jnp.dot(p.astype(jnp.bfloat16),
                             v[:, sl].astype(jnp.bfloat16),
                             preferred_element_type=jnp.float32))
    attn = jnp.concatenate(heads, axis=-1)                  # (S, H) fp32

    # ---- output projection + residual -----------------------------------------
    x = x + jnp.dot(attn.astype(jnp.bfloat16), wo_ref[...],
                    preferred_element_type=jnp.float32)

    # ---- RMSNorm 2 + SwiGLU MLP + residual -------------------------------------
    var2 = jnp.mean(x * x, axis=-1, keepdims=True)
    xn2 = x * lax.rsqrt(var2 + EPS) * norm2_ref[...]
    h13 = jnp.dot(xn2.astype(jnp.bfloat16), w13_ref[...],
                  preferred_element_type=jnp.float32)       # (S, 2I)
    a = h13[:, :I]
    m = (a * jax.nn.sigmoid(a)) * h13[:, I:]                # silu(w1 x) * (w3 x)
    out_ref[...] = x + jnp.dot(m.astype(jnp.bfloat16), w2_ref[...],
                               preferred_element_type=jnp.float32)


# ------------------------------- wrapper --------------------------------------
@jax.jit
def transformer_block(x, params):
    """x: (B, S, H) float32 -> (B, S, H) float32 (eval mode)."""
    (norm1_w, wqkv, wo, norm2_w, w13, w2, cos_t, sin_t) = params
    x_flat = x.reshape(B * S, H)

    per_batch = pl.BlockSpec((S, H), lambda b: (b, 0))      # one batch tile / step
    const2 = lambda shape: pl.BlockSpec(shape, lambda b: (0, 0))  # fetched once

    out = pl.pallas_call(
        block_kernel,
        out_shape=jax.ShapeDtypeStruct((B * S, H), jnp.float32),
        grid=(B,),
        in_specs=[
            per_batch,                 # x (this batch's rows)
            const2((1, H)),            # attention norm weight
            const2((H, 3 * H)),        # fused Wq|Wk|Wv (bf16)
            const2((H, H)),            # Wo (bf16)
            const2((1, H)),            # mlp norm weight
            const2((H, 2 * I)),        # fused W1|W3 (bf16)
            const2((I, H)),            # W2 (bf16)
            const2((S, H)),            # shared cos table (tiled over heads)
            const2((S, H)),            # shared pre-rolled signed sin table
        ],
        out_specs=per_batch,
        input_output_aliases={0: 0},                        # residual in-place
        compiler_params=pltpu.CompilerParams(
            dimension_semantics=("parallel",)),             # 2nd TC on v7x
    )(x_flat, norm1_w, wqkv, wo, norm2_w, w13, w2, cos_t, sin_t)
    return out.reshape(B, S, H)


# --------------------------- pure-JAX reference --------------------------------
def reference_block(x, norm1_w, wqkv, wo, norm2_w, w13, w2, cos_t, sin_t):
    """fp32 reference (eval mode); uses the same bf16-rounded weight values."""
    wqkv = wqkv.astype(jnp.float32)
    wo = wo.astype(jnp.float32)
    w13 = w13.astype(jnp.float32)
    w2 = w2.astype(jnp.float32)

    def rms(t, w):
        v = jnp.mean(t * t, axis=-1, keepdims=True)
        return t * lax.rsqrt(v + EPS) * w

    def rope(t):                                            # (B, S, NH, HD)
        c = cos_t[None, :, None, :]
        s = sin_t[None, :, None, :]
        d2 = HD // 2
        rot = jnp.concatenate([-t[..., d2:], t[..., :d2]], axis=-1)
        return t * c + rot * s

    xn = rms(x, norm1_w)
    qkv = xn @ wqkv
    q = qkv[..., :H].reshape(B, S, NH, HD)
    k = qkv[..., H:2 * H].reshape(B, S, NH, HD)
    v = qkv[..., 2 * H:].reshape(B, S, NH, HD)
    q, k = rope(q), rope(k)
    sc = jnp.einsum('bqhd,bkhd->bhqk', q, k) / math.sqrt(HD)
    mask = jnp.where(jnp.arange(S)[:, None] >= jnp.arange(S)[None, :], 0.0, -1e30)
    sc = sc + mask[None, None]
    p = jax.nn.softmax(sc, axis=-1)
    o = jnp.einsum('bhqk,bkhd->bqhd', p, v).reshape(B, S, H)
    x = x + o @ wo

    xn = rms(x, norm2_w)
    h13 = xn @ w13
    x = x + (jax.nn.silu(h13[..., :I]) * h13[..., I:]) @ w2
    return x


# ----------------------------------- main ---------------------------------------
if __name__ == "__main__":
    key = jax.random.PRNGKey(0)
    keys = jax.random.split(key, 10)

    x = jax.random.normal(keys[0], (B, S, H), dtype=jnp.float32)

    scale_w = 0.02
    norm1_w = 1.0 + 0.1 * jax.random.normal(keys[1], (1, H), dtype=jnp.float32)
    norm2_w = 1.0 + 0.1 * jax.random.normal(keys[2], (1, H), dtype=jnp.float32)
    wq = scale_w * jax.random.normal(keys[3], (H, H), dtype=jnp.float32)
    wk = scale_w * jax.random.normal(keys[4], (H, H), dtype=jnp.float32)
    wv = scale_w * jax.random.normal(keys[5], (H, H), dtype=jnp.float32)
    wo = scale_w * jax.random.normal(keys[6], (H, H), dtype=jnp.float32)
    w1 = scale_w * jax.random.normal(keys[7], (H, I), dtype=jnp.float32)
    w2 = scale_w * jax.random.normal(keys[8], (I, H), dtype=jnp.float32)
    w3 = scale_w * jax.random.normal(keys[9], (H, I), dtype=jnp.float32)

    # Fused projection weights, stored in bf16 (halves weight DMA; native MXU path).
    wqkv_b = jnp.concatenate([wq, wk, wv], axis=1).astype(jnp.bfloat16)   # (H, 3H)
    w13_b = jnp.concatenate([w1, w3], axis=1).astype(jnp.bfloat16)        # (H, 2I)
    wo_b = wo.astype(jnp.bfloat16)
    w2_b = w2.astype(jnp.bfloat16)

    # Rotary tables (rotate-half convention), start_pos = 0.
    inv_freq = 1.0 / (10000.0 ** (jnp.arange(0, HD, 2, dtype=jnp.float32) / HD))
    pos = jnp.arange(S, dtype=jnp.float32)
    ang = pos[:, None] * inv_freq[None, :]                  # (S, HD/2)
    cos_h, sin_h = jnp.cos(ang), jnp.sin(ang)
    cos_ref_t = jnp.concatenate([cos_h, cos_h], axis=-1)    # (S, HD) reference tables
    sin_ref_t = jnp.concatenate([sin_h, sin_h], axis=-1)

    # Kernel tables: one shared pair, tiled across the NH heads to (S, H);
    # the sin table is pre-rolled by HD/2 with the rotate-half sign folded in,
    # so RoPE = t*cos + roll(t*sin_pre). The 1/sqrt(HD) scale is applied as a
    # scalar multiply inside the kernel (no duplicated q/k tables).
    cos_full = jnp.tile(cos_ref_t, (1, NH))                               # (S, H)
    sin_pre_full = jnp.tile(jnp.concatenate([sin_h, -sin_h], axis=-1), (1, NH))

    params = (norm1_w, wqkv_b, wo_b, norm2_w, w13_b, w2_b,
              cos_full, sin_pre_full)

    out = transformer_block(x, params)
    out = jax.block_until_ready(out)

    ref = reference_block(x, norm1_w, wqkv_b, wo_b, norm2_w, w13_b, w2_b,
                          cos_ref_t, sin_ref_t)
    assert out.shape == (B, S, H)
    max_err = float(jnp.max(jnp.abs(out - ref)))
    # bf16 matmul operands (fp32 accumulation) + approx reciprocal => relaxed tol.
    assert jnp.allclose(out, ref, rtol=1e-2, atol=1e-2), \
        f"mismatch vs reference (max |err| = {max_err})"

    print("KERNEL_OK")
</pallas_src>

<mosaic_0001>
module attributes {stable_mosaic.version = 11 : i64} {
  func.func @block_kernel(%arg0: i32, %arg1: memref<16x128xf32, #tpu.memory_space<vmem>>, %arg2: memref<1x128xf32, #tpu.memory_space<vmem>>, %arg3: memref<128x384xbf16, #tpu.memory_space<vmem>>, %arg4: memref<128x128xbf16, #tpu.memory_space<vmem>>, %arg5: memref<1x128xf32, #tpu.memory_space<vmem>>, %arg6: memref<128x512xbf16, #tpu.memory_space<vmem>>, %arg7: memref<256x128xbf16, #tpu.memory_space<vmem>>, %arg8: memref<16x128xf32, #tpu.memory_space<vmem>>, %arg9: memref<16x128xf32, #tpu.memory_space<vmem>>, %arg10: memref<16x128xf32, #tpu.memory_space<vmem>>) attributes {dimension_semantics = [#tpu.dimension_semantics<parallel>], iteration_bounds = array<i64: 2>, scalar_prefetch = 0 : i64, scratch_operands = 0 : i64, tpu.core_type = #tpu.core_type<tc>, window_params = [{transform_indices = @transform_0, window_bounds = array<i64: 16, 128>}, {pipeline_mode = #tpu.pipeline_mode<synchronous>, transform_indices = @transform_1, window_bounds = array<i64: 1, 128>}, {pipeline_mode = #tpu.pipeline_mode<synchronous>, transform_indices = @transform_2, window_bounds = array<i64: 128, 384>}, {pipeline_mode = #tpu.pipeline_mode<synchronous>, transform_indices = @transform_3, window_bounds = array<i64: 128, 128>}, {pipeline_mode = #tpu.pipeline_mode<synchronous>, transform_indices = @transform_4, window_bounds = array<i64: 1, 128>}, {pipeline_mode = #tpu.pipeline_mode<synchronous>, transform_indices = @transform_5, window_bounds = array<i64: 128, 512>}, {pipeline_mode = #tpu.pipeline_mode<synchronous>, transform_indices = @transform_6, window_bounds = array<i64: 256, 128>}, {pipeline_mode = #tpu.pipeline_mode<synchronous>, transform_indices = @transform_7, window_bounds = array<i64: 16, 128>}, {pipeline_mode = #tpu.pipeline_mode<synchronous>, transform_indices = @transform_8, window_bounds = array<i64: 16, 128>}, {transform_indices = @transform_9, window_bounds = array<i64: 16, 128>}]} {
    %c0 = arith.constant 0 : index
    %c0_0 = arith.constant 0 : index
    %0 = vector.load %arg1[%c0, %c0_0] : memref<16x128xf32, #tpu.memory_space<vmem>>, vector<16x128xf32>
    %1 = arith.mulf %0, %0 : vector<16x128xf32>
    %cst = arith.constant dense<0.000000e+00> : vector<16xf32>
    %2 = vector.multi_reduction <add>, %1, %cst [1] : vector<16x128xf32> to vector<16xf32>
    %3 = vector.shape_cast %2 : vector<16xf32> to vector<16x1xf32>
    %cst_1 = arith.constant 1.280000e+02 : f32
    %4 = vector.broadcast %cst_1 : f32 to vector<16x1xf32>
    %5 = arith.divf %3, %4 : vector<16x1xf32>
    %cst_2 = arith.constant 9.99999974E-6 : f32
    %6 = vector.broadcast %cst_2 : f32 to vector<16x1xf32>
    %7 = arith.addf %5, %6 : vector<16x1xf32>
    %8 = math.rsqrt %7 : vector<16x1xf32>
    %9 = vector.broadcast %8 : vector<16x1xf32> to vector<16x128xf32>
    %10 = arith.mulf %0, %9 : vector<16x128xf32>
    %c0_3 = arith.constant 0 : index
    %c0_4 = arith.constant 0 : index
    %11 = vector.load %arg2[%c0_3, %c0_4] : memref<1x128xf32, #tpu.memory_space<vmem>>, vector<1x128xf32>
    %12 = vector.broadcast %11 : vector<1x128xf32> to vector<16x128xf32>
    %13 = arith.mulf %10, %12 : vector<16x128xf32>
    %14 = arith.truncf %13 : vector<16x128xf32> to vector<16x128xbf16>
    %c0_5 = arith.constant 0 : index
    %c0_6 = arith.constant 0 : index
    %15 = vector.load %arg3[%c0_5, %c0_6] : memref<128x384xbf16, #tpu.memory_space<vmem>>, vector<128x384xbf16>
    %cst_7 = arith.constant dense<0.000000e+00> : vector<16x384xf32>
    %16 = tpu.matmul %14, %15, %cst_7 {dimension_numbers = #tpu.dot_dimension_numbers<[1], [0], [0], [1], [0, 0, 1, 1], [], []>} : vector<16x128xbf16>, vector<128x384xbf16>, vector<16x384xf32> -> vector<16x384xf32>
    %17 = vector.extract_strided_slice %16 {offsets = [0, 0], sizes = [16, 128], strides = [1, 1]} : vector<16x384xf32> to vector<16x128xf32>
    %18 = vector.extract_strided_slice %16 {offsets = [0, 128], sizes = [16, 128], strides = [1, 1]} : vector<16x384xf32> to vector<16x128xf32>
    %19 = vector.extract_strided_slice %16 {offsets = [0, 256], sizes = [16, 128], strides = [1, 1]} : vector<16x384xf32> to vector<16x128xf32>
    %c0_8 = arith.constant 0 : index
    %c0_9 = arith.constant 0 : index
    %20 = vector.load %arg8[%c0_8, %c0_9] : memref<16x128xf32, #tpu.memory_space<vmem>>, vector<16x128xf32>
    %c0_10 = arith.constant 0 : index
    %c0_11 = arith.constant 0 : index
    %21 = vector.load %arg9[%c0_10, %c0_11] : memref<16x128xf32, #tpu.memory_space<vmem>>, vector<16x128xf32>
    %22 = tpu.iota {dimensions = array<i32: 1>} : vector<16x128xi32>
    %c32_i32 = arith.constant 32 : i32
    %c0_i32 = arith.constant 0 : i32
    %23 = arith.cmpi eq, %c32_i32, %c0_i32 : i32
    %c1_i32 = arith.constant 1 : i32
    %24 = arith.select %23, %c1_i32, %c32_i32 : i32
    %25 = vector.broadcast %24 : i32 to vector<16x128xi32>
    %26 = arith.remsi %22, %25 : vector<16x128xi32>
    %c0_i32_12 = arith.constant 0 : i32
    %27 = vector.broadcast %c0_i32_12 : i32 to vector<16x128xi32>
    %28 = arith.cmpi ne, %26, %27 : vector<16x128xi32>
    %c0_i32_13 = arith.constant 0 : i32
    %29 = vector.broadcast %c0_i32_13 : i32 to vector<16x128xi32>
    %30 = arith.cmpi slt, %26, %29 : vector<16x128xi32>
    %c0_i32_14 = arith.constant 0 : i32
    %31 = arith.cmpi slt, %24, %c0_i32_14 : i32
    %32 = vector.broadcast %31 : i1 to vector<16x128xi1>
    %33 = vector.broadcast %32 : vector<16x128xi1> to vector<16x128xi1>
    %34 = arith.xori %30, %33 : vector<16x128xi1>
    %35 = arith.andi %34, %28 : vector<16x128xi1>
    %36 = vector.broadcast %24 : i32 to vector<16x128xi32>
    %37 = arith.addi %26, %36 : vector<16x128xi32>
    %38 = arith.select %35, %37, %26 : vector<16x128xi1>, vector<16x128xi32>
    %c16_i32 = arith.constant 16 : i32
    %39 = vector.broadcast %c16_i32 : i32 to vector<16x128xi32>
    %40 = arith.cmpi slt, %38, %39 : vector<16x128xi32>
    %41 = arith.mulf %17, %20 : vector<16x128xf32>
    %42 = arith.mulf %17, %21 : vector<16x128xf32>
    %c112_i32 = arith.constant 112 : i32
    %43 = tpu.dynamic_rotate %42 by %c112_i32 dim 1 : vector<16x128xf32>, i32 -> vector<16x128xf32>
    %c16_i32_15 = arith.constant 16 : i32
    %44 = tpu.dynamic_rotate %42 by %c16_i32_15 dim 1 : vector<16x128xf32>, i32 -> vector<16x128xf32>
    %45 = arith.select %40, %43, %44 : vector<16x128xi1>, vector<16x128xf32>
    %46 = arith.addf %41, %45 : vector<16x128xf32>
    %cst_16 = arith.constant 0.176776692 : f32
    %47 = vector.broadcast %cst_16 : f32 to vector<16x128xf32>
    %48 = arith.mulf %46, %47 : vector<16x128xf32>
    %49 = arith.mulf %18, %20 : vector<16x128xf32>
    %50 = arith.mulf %18, %21 : vector<16x128xf32>
    %c112_i32_17 = arith.constant 112 : i32
    %51 = tpu.dynamic_rotate %50 by %c112_i32_17 dim 1 : vector<16x128xf32>, i32 -> vector<16x128xf32>
    %c16_i32_18 = arith.constant 16 : i32
    %52 = tpu.dynamic_rotate %50 by %c16_i32_18 dim 1 : vector<16x128xf32>, i32 -> vector<16x128xf32>
    %53 = arith.select %40, %51, %52 : vector<16x128xi1>, vector<16x128xf32>
    %54 = arith.addf %49, %53 : vector<16x128xf32>
    %55 = tpu.iota {dimensions = array<i32: 0>} : vector<16x16xi32>
    %56 = tpu.iota {dimensions = array<i32: 1>} : vector<16x16xi32>
    %57 = arith.cmpi sge, %55, %56 : vector<16x16xi32>
    %cst_19 = arith.constant 0.000000e+00 : f32
    %cst_20 = arith.constant -1.000000e+30 : f32
    %58 = vector.broadcast %cst_19 : f32 to vector<16x16xf32>
    %59 = vector.broadcast %cst_20 : f32 to vector<16x16xf32>
    %60 = arith.select %57, %58, %59 : vector<16x16xi1>, vector<16x16xf32>
    %61 = vector.extract_strided_slice %48 {offsets = [0, 0], sizes = [16, 32], strides = [1, 1]} : vector<16x128xf32> to vector<16x32xf32>
    %62 = arith.truncf %61 : vector<16x32xf32> to vector<16x32xbf16>
    %63 = vector.extract_strided_slice %54 {offsets = [0, 0], sizes = [16, 32], strides = [1, 1]} : vector<16x128xf32> to vector<16x32xf32>
    %64 = arith.truncf %63 : vector<16x32xf32> to vector<16x32xbf16>
    %cst_21 = arith.constant dense<0.000000e+00> : vector<16x16xf32>
    %65 = tpu.matmul %62, %64, %cst_21 {dimension_numbers = #tpu.dot_dimension_numbers<[1], [1], [0], [0], [0, 0, 1, 0], [], []>} : vector<16x32xbf16>, vector<16x32xbf16>, vector<16x16xf32> -> vector<16x16xf32>
    %66 = arith.addf %65, %60 : vector<16x16xf32>
    %cst_22 = arith.constant dense<0xFF800000> : vector<16xf32>
    %67 = vector.multi_reduction <maximumf>, %66, %cst_22 [1] : vector<16x16xf32> to vector<16xf32>
    %68 = vector.shape_cast %67 : vector<16xf32> to vector<16x1xf32>
    %69 = vector.broadcast %68 : vector<16x1xf32> to vector<16x16xf32>
    %70 = arith.subf %66, %69 : vector<16x16xf32>
    %71 = math.exp %70 : vector<16x16xf32>
    %cst_23 = arith.constant dense<0.000000e+00> : vector<16xf32>
    %72 = vector.multi_reduction <add>, %71, %cst_23 [1] : vector<16x16xf32> to vector<16xf32>
    %73 = vector.shape_cast %72 : vector<16xf32> to vector<16x1xf32>
    %74 = tpu.reciprocal %73 {approx = true} : vector<16x1xf32> -> vector<16x1xf32>
    %75 = vector.broadcast %74 : vector<16x1xf32> to vector<16x16xf32>
    %76 = arith.mulf %71, %75 : vector<16x16xf32>
    %77 = arith.truncf %76 : vector<16x16xf32> to vector<16x16xbf16>
    %78 = vector.extract_strided_slice %19 {offsets = [0, 0], sizes = [16, 32], strides = [1, 1]} : vector<16x128xf32> to vector<16x32xf32>
    %79 = arith.truncf %78 : vector<16x32xf32> to vector<16x32xbf16>
    %cst_24 = arith.constant dense<0.000000e+00> : vector<16x32xf32>
    %80 = tpu.matmul %77, %79, %cst_24 {dimension_numbers = #tpu.dot_dimension_numbers<[1], [0], [0], [1], [0, 0, 1, 1], [], []>} : vector<16x16xbf16>, vector<16x32xbf16>, vector<16x32xf32> -> vector<16x32xf32>
    %81 = vector.extract_strided_slice %48 {offsets = [0, 32], sizes = [16, 32], strides = [1, 1]} : vector<16x128xf32> to vector<16x32xf32>
    %82 = arith.truncf %81 : vector<16x32xf32> to vector<16x32xbf16>
    %83 = vector.extract_strided_slice %54 {offsets = [0, 32], sizes = [16, 32], strides = [1, 1]} : vector<16x128xf32> to vector<16x32xf32>
    %84 = arith.truncf %83 : vector<16x32xf32> to vector<16x32xbf16>
    %cst_25 = arith.constant dense<0.000000e+00> : vector<16x16xf32>
    %85 = tpu.matmul %82, %84, %cst_25 {dimension_numbers = #tpu.dot_dimension_numbers<[1], [1], [0], [0], [0, 0, 1, 0], [], []>} : vector<16x32xbf16>, vector<16x32xbf16>, vector<16x16xf32> -> vector<16x16xf32>
    %86 = arith.addf %85, %60 : vector<16x16xf32>
    %cst_26 = arith.constant dense<0xFF800000> : vector<16xf32>
    %87 = vector.multi_reduction <maximumf>, %86, %cst_26 [1] : vector<16x16xf32> to vector<16xf32>
    %88 = vector.shape_cast %87 : vector<16xf32> to vector<16x1xf32>
    %89 = vector.broadcast %88 : vector<16x1xf32> to vector<16x16xf32>
    %90 = arith.subf %86, %89 : vector<16x16xf32>
    %91 = math.exp %90 : vector<16x16xf32>
    %cst_27 = arith.constant dense<0.000000e+00> : vector<16xf32>
    %92 = vector.multi_reduction <add>, %91, %cst_27 [1] : vector<16x16xf32> to vector<16xf32>
    %93 = vector.shape_cast %92 : vector<16xf32> to vector<16x1xf32>
    %94 = tpu.reciprocal %93 {approx = true} : vector<16x1xf32> -> vector<16x1xf32>
    %95 = vector.broadcast %94 : vector<16x1xf32> to vector<16x16xf32>
    %96 = arith.mulf %91, %95 : vector<16x16xf32>
    %97 = arith.truncf %96 : vector<16x16xf32> to vector<16x16xbf16>
    %98 = vector.extract_strided_slice %19 {offsets = [0, 32], sizes = [16, 32], strides = [1, 1]} : vector<16x128xf32> to vector<16x32xf32>
    %99 = arith.truncf %98 : vector<16x32xf32> to vector<16x32xbf16>
    %cst_28 = arith.constant dense<0.000000e+00> : vector<16x32xf32>
    %100 = tpu.matmul %97, %99, %cst_28 {dimension_numbers = #tpu.dot_dimension_numbers<[1], [0], [0], [1], [0, 0, 1, 1], [], []>} : vector<16x16xbf16>, vector<16x32xbf16>, vector<16x32xf32> -> vector<16x32xf32>
    %101 = vector.extract_strided_slice %48 {offsets = [0, 64], sizes = [16, 32], strides = [1, 1]} : vector<16x128xf32> to vector<16x32xf32>
    %102 = arith.truncf %101 : vector<16x32xf32> to vector<16x32xbf16>
    %103 = vector.extract_strided_slice %54 {offsets = [0, 64], sizes = [16, 32], strides = [1, 1]} : vector<16x128xf32> to vector<16x32xf32>
    %104 = arith.truncf %103 : vector<16x32xf32> to vector<16x32xbf16>
    %cst_29 = arith.constant dense<0.000000e+00> : vector<16x16xf32>
    %105 = tpu.matmul %102, %104, %cst_29 {dimension_numbers = #tpu.dot_dimension_numbers<[1], [1], [0], [0], [0, 0, 1, 0], [], []>} : vector<16x32xbf16>, vector<16x32xbf16>, vector<16x16xf32> -> vector<16x16xf32>
    %106 = arith.addf %105, %60 : vector<16x16xf32>
    %cst_30 = arith.constant dense<0xFF800000> : vector<16xf32>
    %107 = vector.multi_reduction <maximumf>, %106, %cst_30 [1] : vector<16x16xf32> to vector<16xf32>
    %108 = vector.shape_cast %107 : vector<16xf32> to vector<16x1xf32>
    %109 = vector.broadcast %108 : vector<16x1xf32> to vector<16x16xf32>
    %110 = arith.subf %106, %109 : vector<16x16xf32>
    %111 = math.exp %110 : vector<16x16xf32>
    %cst_31 = arith.constant dense<0.000000e+00> : vector<16xf32>
    %112 = vector.multi_reduction <add>, %111, %cst_31 [1] : vector<16x16xf32> to vector<16xf32>
    %113 = vector.shape_cast %112 : vector<16xf32> to vector<16x1xf32>
    %114 = tpu.reciprocal %113 {approx = true} : vector<16x1xf32> -> vector<16x1xf32>
    %115 = vector.broadcast %114 : vector<16x1xf32> to vector<16x16xf32>
    %116 = arith.mulf %111, %115 : vector<16x16xf32>
    %117 = arith.truncf %116 : vector<16x16xf32> to vector<16x16xbf16>
    %118 = vector.extract_strided_slice %19 {offsets = [0, 64], sizes = [16, 32], strides = [1, 1]} : vector<16x128xf32> to vector<16x32xf32>
    %119 = arith.truncf %118 : vector<16x32xf32> to vector<16x32xbf16>
    %cst_32 = arith.constant dense<0.000000e+00> : vector<16x32xf32>
    %120 = tpu.matmul %117, %119, %cst_32 {dimension_numbers = #tpu.dot_dimension_numbers<[1], [0], [0], [1], [0, 0, 1, 1], [], []>} : vector<16x16xbf16>, vector<16x32xbf16>, vector<16x32xf32> -> vector<16x32xf32>
    %121 = vector.extract_strided_slice %48 {offsets = [0, 96], sizes = [16, 32], strides = [1, 1]} : vector<16x128xf32> to vector<16x32xf32>
    %122 = arith.truncf %121 : vector<16x32xf32> to vector<16x32xbf16>
    %123 = vector.extract_strided_slice %54 {offsets = [0, 96], sizes = [16, 32], strides = [1, 1]} : vector<16x128xf32> to vector<16x32xf32>
    %124 = arith.truncf %123 : vector<16x32xf32> to vector<16x32xbf16>
    %cst_33 = arith.constant dense<0.000000e+00> : vector<16x16xf32>
    %125 = tpu.matmul %122, %124, %cst_33 {dimension_numbers = #tpu.dot_dimension_numbers<[1], [1], [0], [0], [0, 0, 1, 0], [], []>} : vector<16x32xbf16>, vector<16x32xbf16>, vector<16x16xf32> -> vector<16x16xf32>
    %126 = arith.addf %125, %60 : vector<16x16xf32>
    %cst_34 = arith.constant dense<0xFF800000> : vector<16xf32>
    %127 = vector.multi_reduction <maximumf>, %126, %cst_34 [1] : vector<16x16xf32> to vector<16xf32>
    %128 = vector.shape_cast %127 : vector<16xf32> to vector<16x1xf32>
    %129 = vector.broadcast %128 : vector<16x1xf32> to vector<16x16xf32>
    %130 = arith.subf %126, %129 : vector<16x16xf32>
    %131 = math.exp %130 : vector<16x16xf32>
    %cst_35 = arith.constant dense<0.000000e+00> : vector<16xf32>
    %132 = vector.multi_reduction <add>, %131, %cst_35 [1] : vector<16x16xf32> to vector<16xf32>
    %133 = vector.shape_cast %132 : vector<16xf32> to vector<16x1xf32>
    %134 = tpu.reciprocal %133 {approx = true} : vector<16x1xf32> -> vector<16x1xf32>
    %135 = vector.broadcast %134 : vector<16x1xf32> to vector<16x16xf32>
    %136 = arith.mulf %131, %135 : vector<16x16xf32>
    %137 = arith.truncf %136 : vector<16x16xf32> to vector<16x16xbf16>
    %138 = vector.extract_strided_slice %19 {offsets = [0, 96], sizes = [16, 32], strides = [1, 1]} : vector<16x128xf32> to vector<16x32xf32>
    %139 = arith.truncf %138 : vector<16x32xf32> to vector<16x32xbf16>
    %cst_36 = arith.constant dense<0.000000e+00> : vector<16x32xf32>
    %140 = tpu.matmul %137, %139, %cst_36 {dimension_numbers = #tpu.dot_dimension_numbers<[1], [0], [0], [1], [0, 0, 1, 1], [], []>} : vector<16x16xbf16>, vector<16x32xbf16>, vector<16x32xf32> -> vector<16x32xf32>
    %141 = tpu.concatenate %80, %100, %120, %140 in 1 : vector<16x32xf32>, vector<16x32xf32>, vector<16x32xf32>, vector<16x32xf32> -> vector<16x128xf32>
    %142 = arith.truncf %141 : vector<16x128xf32> to vector<16x128xbf16>
    %c0_37 = arith.constant 0 : index
    %c0_38 = arith.constant 0 : index
    %143 = vector.load %arg4[%c0_37, %c0_38] : memref<128x128xbf16, #tpu.memory_space<vmem>>, vector<128x128xbf16>
    %cst_39 = arith.constant dense<0.000000e+00> : vector<16x128xf32>
    %144 = tpu.matmul %142, %143, %cst_39 {dimension_numbers = #tpu.dot_dimension_numbers<[1], [0], [0], [1], [0, 0, 1, 1], [], []>} : vector<16x128xbf16>, vector<128x128xbf16>, vector<16x128xf32> -> vector<16x128xf32>
    %145 = arith.addf %0, %144 : vector<16x128xf32>
    %146 = arith.mulf %145, %145 : vector<16x128xf32>
    %cst_40 = arith.constant dense<0.000000e+00> : vector<16xf32>
    %147 = vector.multi_reduction <add>, %146, %cst_40 [1] : vector<16x128xf32> to vector<16xf32>
    %148 = vector.shape_cast %147 : vector<16xf32> to vector<16x1xf32>
    %cst_41 = arith.constant 1.280000e+02 : f32
    %149 = vector.broadcast %cst_41 : f32 to vector<16x1xf32>
    %150 = arith.divf %148, %149 : vector<16x1xf32>
    %cst_42 = arith.constant 9.99999974E-6 : f32
    %151 = vector.broadcast %cst_42 : f32 to vector<16x1xf32>
    %152 = arith.addf %150, %151 : vector<16x1xf32>
    %153 = math.rsqrt %152 : vector<16x1xf32>
    %154 = vector.broadcast %153 : vector<16x1xf32> to vector<16x128xf32>
    %155 = arith.mulf %145, %154 : vector<16x128xf32>
    %c0_43 = arith.constant 0 : index
    %c0_44 = arith.constant 0 : index
    %156 = vector.load %arg5[%c0_43, %c0_44] : memref<1x128xf32, #tpu.memory_space<vmem>>, vector<1x128xf32>
    %157 = vector.broadcast %156 : vector<1x128xf32> to vector<16x128xf32>
    %158 = arith.mulf %155, %157 : vector<16x128xf32>
    %159 = arith.truncf %158 : vector<16x128xf32> to vector<16x128xbf16>
    %c0_45 = arith.constant 0 : index
    %c0_46 = arith.constant 0 : index
    %160 = vector.load %arg6[%c0_45, %c0_46] : memref<128x512xbf16, #tpu.memory_space<vmem>>, vector<128x512xbf16>
    %cst_47 = arith.constant dense<0.000000e+00> : vector<16x512xf32>
    %161 = tpu.matmul %159, %160, %cst_47 {dimension_numbers = #tpu.dot_dimension_numbers<[1], [0], [0], [1], [0, 0, 1, 1], [], []>} : vector<16x128xbf16>, vector<128x512xbf16>, vector<16x512xf32> -> vector<16x512xf32>
    %162 = vector.extract_strided_slice %161 {offsets = [0, 0], sizes = [16, 256], strides = [1, 1]} : vector<16x512xf32> to vector<16x256xf32>
    %163 = arith.negf %162 : vector<16x256xf32>
    %164 = math.exp %163 : vector<16x256xf32>
    %cst_48 = arith.constant 1.000000e+00 : f32
    %165 = vector.broadcast %cst_48 : f32 to vector<16x256xf32>
    %166 = arith.addf %165, %164 : vector<16x256xf32>
    %167 = arith.divf %165, %166 : vector<16x256xf32>
    %168 = arith.mulf %162, %167 : vector<16x256xf32>
    %169 = vector.extract_strided_slice %161 {offsets = [0, 256], sizes = [16, 256], strides = [1, 1]} : vector<16x512xf32> to vector<16x256xf32>
    %170 = arith.mulf %168, %169 : vector<16x256xf32>
    %171 = arith.truncf %170 : vector<16x256xf32> to vector<16x256xbf16>
    %c0_49 = arith.constant 0 : index
    %c0_50 = arith.constant 0 : index
    %172 = vector.load %arg7[%c0_49, %c0_50] : memref<256x128xbf16, #tpu.memory_space<vmem>>, vector<256x128xbf16>
    %cst_51 = arith.constant dense<0.000000e+00> : vector<16x128xf32>
    %173 = tpu.matmul %171, %172, %cst_51 {dimension_numbers = #tpu.dot_dimension_numbers<[1], [0], [0], [1], [0, 0, 1, 1], [], []>} : vector<16x256xbf16>, vector<256x128xbf16>, vector<16x128xf32> -> vector<16x128xf32>
    %174 = arith.addf %145, %173 : vector<16x128xf32>
    %c0_52 = arith.constant 0 : index
    %c0_53 = arith.constant 0 : index
    %175 = vector.load %arg10[%c0_52, %c0_53] : memref<16x128xf32, #tpu.memory_space<vmem>>, vector<16x128xf32>
    tpu.vector_store %arg10[%c0_52, %c0_53], %174 {strides = array<i32>} : memref<16x128xf32, #tpu.memory_space<vmem>>, vector<16x128xf32>,
    return
  }
  func.func @transform_0(%arg0: i32) -> (i32, i32) {
    %c0_i32 = arith.constant 0 : i32
    %c0_i32_0 = arith.constant 0 : i32
    return %arg0, %c0_i32 : i32, i32
  }
  func.func @transform_1(%arg0: i32) -> (i32, i32) {
    %c0_i32 = arith.constant 0 : i32
    %c0_i32_0 = arith.constant 0 : i32
    %c0_i32_1 = arith.constant 0 : i32
    return %c0_i32, %c0_i32_0 : i32, i32
  }
  func.func @transform_2(%arg0: i32) -> (i32, i32) {
    %c0_i32 = arith.constant 0 : i32
    %c0_i32_0 = arith.constant 0 : i32
    %c0_i32_1 = arith.constant 0 : i32
    return %c0_i32, %c0_i32_0 : i32, i32
  }
  func.func @transform_3(%arg0: i32) -> (i32, i32) {
    %c0_i32 = arith.constant 0 : i32
    %c0_i32_0 = arith.constant 0 : i32
    %c0_i32_1 = arith.constant 0 : i32
    return %c0_i32, %c0_i32_0 : i32, i32
  }
  func.func @transform_4(%arg0: i32) -> (i32, i32) {
    %c0_i32 = arith.constant 0 : i32
    %c0_i32_0 = arith.constant 0 : i32
    %c0_i32_1 = arith.constant 0 : i32
    return %c0_i32, %c0_i32_0 : i32, i32
  }
  func.func @transform_5(%arg0: i32) -> (i32, i32) {
    %c0_i32 = arith.constant 0 : i32
    %c0_i32_0 = arith.constant 0 : i32
    %c0_i32_1 = arith.constant 0 : i32
    return %c0_i32, %c0_i32_0 : i32, i32
  }
  func.func @transform_6(%arg0: i32) -> (i32, i32) {
    %c0_i32 = arith.constant 0 : i32
    %c0_i32_0 = arith.constant 0 : i32
    %c0_i32_1 = arith.constant 0 : i32
    return %c0_i32, %c0_i32_0 : i32, i32
  }
  func.func @transform_7(%arg0: i32) -> (i32, i32) {
    %c0_i32 = arith.constant 0 : i32
    %c0_i32_0 = arith.constant 0 : i32
    %c0_i32_1 = arith.constant 0 : i32
    return %c0_i32, %c0_i32_0 : i32, i32
  }
  func.func @transform_8(%arg0: i32) -> (i32, i32) {
    %c0_i32 = arith.constant 0 : i32
    %c0_i32_0 = arith.constant 0 : i32
    %c0_i32_1 = arith.constant 0 : i32
    return %c0_i32, %c0_i32_0 : i32, i32
  }
  func.func @transform_9(%arg0: i32) -> (i32, i32) {
    %c0_i32 = arith.constant 0 : i32
    %c0_i32_0 = arith.constant 0 : i32
    return %arg0, %c0_i32 : i32, i32
  }
}

</mosaic_0001>

<bundles_post_ra>
// kernel: transformer_block.1
= control target key start
LH: loop header
LB: loop body
LE: loop exit
PB: predicated region body
PF: predicated region fallthrough
CT: control target
= control target key end

     0   :  { %14 = vsyncpa [#allocation3], 0  ;;  %s2740_s0 = inlined_call_operand.vmem [shape: f32[32,128], index: 0, kind: input, shape index: {}, may-alias: {0,9}]   ;;  %s2741_s1 = inlined_call_operand.vmem [shape: f32[1,128], index: 1, kind: input, shape index: {}]   ;;  %s2742_s2 = inlined_call_operand.hbm [shape: bf16[128,384], index: 2, kind: input, shape index: {}]   ;;  %s2743_s3 = inlined_call_operand.hbm [shape: bf16[128,128], index: 3, kind: input, shape index: {}]   ;;  %s2744_s4 = inlined_call_operand.vmem [shape: f32[1,128], index: 4, kind: input, shape index: {}]   ;;  %s2745_s5 = inlined_call_operand.hbm [shape: bf16[128,512], index: 5, kind: input, shape index: {}]   ;;  %s2746_s6 = inlined_call_operand.hbm [shape: bf16[256,128], index: 6, kind: input, shape index: {}]   ;;  %s2747_s7 = inlined_call_operand.vmem [shape: f32[16,128], index: 7, kind: input, shape index: {}]   ;;  %s2748_s8 = inlined_call_operand.vmem [shape: f32[16,128], index: 8, kind: input, shape index: {}]   ;;  %s2749_s9 = inlined_call_operand.vmem [shape: f32[32,128], index: 9, kind: output, shape index: {}, may-alias: {0,9}]  }
   0x1   :  { %15 = vsyncpa [#allocation5], 0 }
   0x2   :  { %16 = vsyncpa [#allocation8], 0  ;;  %s2501_s30 = smov 0  }
   0x3 LB: > { %s275_s12 = sshll.u32 %s2743_s3, 4  ;;  %s2750_s13 = sadd.s32 4294967295, %s2432_s30   ;;  %s2432_s30 = sphi %s2501_s30, %s22_s30   ;;  %s276_s12 = int_to_ptr.hbm [resolvable:$true] %s275_s12 }
   0x4   : > { %p1728_p0 = scmp.ge.s32.totalorder %s2432_s30, 1  ;;  %p247_p1 = scmp.lt.s32.totalorder %s2432_s30, 3 }
   0x5   : > { %p2514_p2 = scmp.eq.s32.totalorder %s2750_s13, 0  ;;  %s2434_s16 = smov [#allocation4]  }
   0x6   : > { %p2518_p3 = pnand %p1728_p0, %p247_p1  ;;  %s277_s17 = sshll.u32 %s2434_s16, 4  ;;  %s278_s17 = int_to_ptr.vmem [resolvable:$true] %s277_s17 }
   0x7   : > { %s261_s20 = sshll.u32 %s2742_s2, 4  ;;  %s2435_s22 = smov [#allocation2]   ;;  %s262_s20 = int_to_ptr.hbm [resolvable:$true] %s261_s20 }
   0x8   : > { %p2173_p4 = pneg %p2518_p3  ;;  %s263_s23 = sshll.u32 %s2435_s22, 4  ;;  %s264_s23 = int_to_ptr.vmem [resolvable:$true] %s263_s23 }
   0x9   : > { %s2436_s24 = smov 64   ;;  %s2437_s25 = smov 4  }
   0xa   : > { %p2529_p5 = pnand %p2514_p2, %p2173_p4  ;;  %s292_s28 = sshll.u32 %s2745_s5, 4  ;;  %s293_s28 = int_to_ptr.hbm [resolvable:$true] %s292_s28 }
   0xb   : > { %s2438_s29 = smov 192   ;;  %s2439_s10 = smov 12  }
   0xc   : > { %2179 = dma.hbm_to_vmem [thread:$0]  (!%p2529_p5), %s276_s12, 1024, %s278_s17, [#allocation5], %s2436_s24, %s2436_s24, %s2437_s25  }
   0xd   : > { %2176 = dma.hbm_to_vmem [thread:$0]  (!%p2529_p5), %s262_s20, 3072, %s264_s23, [#allocation3], %s2438_s29, %s2438_s29, %s2439_s10  }
   0xe   : > { %s2440_s11 = smov [#allocation6]   ;;  %s2441_s18 = smov 256  }
   0xf   : > { %s294_s16 = sshll.u32 %s2440_s11, 4  ;;  %s2442_s19 = smov 16   ;;  %s295_s16 = int_to_ptr.vmem [resolvable:$true] %s294_s16 }
  0x10   : > { %2182 = dma.hbm_to_vmem [thread:$0]  (!%p2529_p5), %s293_s28, 4096, %s295_s16, [#allocation5], %s2441_s18, %s2441_s18, %s2442_s19  }
  0x11   : > { %s306_s12 = sshll.u32 %s2746_s6, 4  ;;  %s2443_s17 = smov [#allocation7]   ;;  %s307_s12 = int_to_ptr.hbm [resolvable:$true] %s306_s12 }
  0x12   : > { %s308_s26 = sshll.u32 %s2443_s17, 4  ;;  %339 = sbr.rel (%p2518_p3) target bundleno = 2160 (0x870), region = 56  ;;  %s309_s26 = int_to_ptr.vmem [resolvable:$true] %s308_s26 }
  0x13   : > { %2185 = dma.hbm_to_vmem [thread:$0]  (!%p2529_p5), %s307_s12, 2048, %s309_s26, [#allocation8], %s2436_s24, %s2436_s24, %s2437_s25  }
  0x17   : > { %2419 = dma.done.wait (%p2514_p2), [#allocation3], 3072  }
  0x18   : > { %2421 = vsyncadd (%p2514_p2), [#allocation3], 4294964224 }
  0x19   : > { %2423 = dma.done.wait (%p2514_p2), [#allocation5], 5120  }
  0x1a   : > { %2425 = vsyncadd (%p2514_p2), [#allocation5], 4294962176 }
  0x1b   : > { %2427 = dma.done.wait (%p2514_p2), [#allocation8], 2048  }
  0x1c   : > { %2429 = vsyncadd (%p2514_p2), [#allocation8], 4294965248  ;;  %s2754_s13 = sadd.s32 4294967295, %s2432_s30   ;;  %v1829_v4 = vld [vmem:[#allocation2 + $0xa8] sm:$0xf]  ;;  %v2444_v11 = vmov 128.0  }
  0x1d   : > { %s1739_s15 = sshll.u32 %s2754_s13, 1  ;;  %v2099_v5 = vld [vmem:[#allocation2 + $0xb0] sm:$0xf0]  ;;  %v2098_v6 = vld [vmem:[#allocation2 + $0xac] sm:$0xf]  ;;  %2236 = vrcp.f32 %v2444_v11  ;;  %s2445_s29 = smov 16  }
  0x1e   : > { %p392_p6 = scmp.lt.s32.totalorder %s1739_s15, 3  ;;  %v1830_v7 = vor.u32 %v2099_v5, %v1829_v4  ;;  %v1831_v8 = vld [vmem:[#allocation2 + $0xb4] sm:$0xf0]  ;;  %v1837_v9 = vld [vmem:[#allocation2 + $0xb0] sm:$0xf]  ;;  %s2446_s10 = smov 112  }
  0x1f   : > { %v2100_v10 = vld [vmem:[#allocation2 + $0xb8] sm:$0xf0]  ;;  %v1834_v12 = vor.u32 %v2098_v6, %v1831_v8  ;;  %v1817_v14 = vld [vmem:[#allocation2 + $0x90] sm:$0xf]  ;;  %v2095_v16 = vld [vmem:[#allocation2 + $0x94] sm:$0xf] }
  0x20   : > { %s2762_s15 = smov (!%p392_p6, %s1739_s15), 3  ;;  %v1838_v13 = vor.u32 %v2100_v10, %v1837_v9  ;;  %612 = vmatpush.bf16.msra.mxu0 %v1830_v7  ;;  %v2096_v15 = vld [vmem:[#allocation2 + $0x98] sm:$0xf0]  ;;  %v1819_v18 = vld [vmem:[#allocation2 + $0x9c] sm:$0xf0]  ;;  %vm716_vm8 = vcmask 261120  }
  0x21   : > { %s1740_s20 = sshll.u32 %s2762_s15, 3  ;;  %626 = vmatpush.bf16.msra.mxu1 %v1834_v12  ;;  %v1818_v17 = vor.u32 %v2096_v15, %v1817_v14  ;;  %v1825_v19 = vld [vmem:[#allocation2 + $0x98] sm:$0xf]  ;;  %v2097_v20 = vld [vmem:[#allocation2 + $0xa0] sm:$0xf0]  ;;  %v1822_v21 = vor.u32 %v2095_v16, %v1819_v18  ;;  %vm737_vm10 = vcmask 130048  }
  0x22   : > { %s395_s24 = scalar_lea.vmem %s2740_s0, %s1740_s20  ;;  %640 = vmatpush.bf16.msra.mxu2 %v1838_v13  ;;  %v1826_v22 = vor.u32 %v2097_v20, %v1825_v19  ;;  %v1805_v24 = vld [vmem:[#allocation2 + $0x78] sm:$0xf]  ;;  %v2093_v25 = vld [vmem:[#allocation2 + $0x80] sm:$0xf0]  ;;  %v2092_v26 = vld [vmem:[#allocation2 + $0x7c] sm:$0xf]  ;;  %s401_s25 = scalar_lea.vmem %s2749_s9, %s1740_s20 }
  0x23   : > { %v2571_v0 = vld [vmem:[%s395_s24] sm:$0xff]  ;;  %v2575_v2 = vld [vmem:[%s395_s24 + $0x8] sm:$0xff]  ;;  %v2579_v23 = vpop.eup %2236  ;;  %v1806_v27 = vor.u32 %v2093_v25, %v1805_v24  ;;  %v1795_v38 = vld [vmem:[#allocation2 + $0x6c] sm:$0xf0]  ;;  %s2448_s17 = smov 96   ;;  %s2449_s26 = smov 32  }
  0x24   : > { %v406_v1 = vmul.f32 %v2571_v0, %v2571_v0  ;;  %v407_v3 = vmul.f32 %v2575_v2, %v2575_v2  ;;  %613 = vmatpush.bf16.msra.mxu0 %v1818_v17  ;;  %v1807_v28 = vld [vmem:[#allocation2 + $0x84] sm:$0xf0]  ;;  %v1813_v29 = vld [vmem:[#allocation2 + $0x80] sm:$0xf]  ;;  %v2094_v30 = vld [vmem:[#allocation2 + $0x88] sm:$0xf0]  ;;  %vm417_vm0 = vweird.f32 %v2579_v23 }
  0x25   : > { %627 = vmatpush.bf16.msra.mxu1 %v1822_v21  ;;  %v1810_v31 = vor.u32 %v2092_v26, %v1807_v28  ;;  %v1814_v32 = vor.u32 %v2094_v30, %v1813_v29  ;;  %v413_v33 = vmul.f32 128.0, %v2579_v23  ;;  %v1793_v34 = vld [vmem:[#allocation2 + $0x60] sm:$0xf]  ;;  %v2090_v35 = vld [vmem:[#allocation2 + $0x68] sm:$0xf0]  ;;  %s2450_s13 = smov 64  }
  0x26   : > { %408 = vadd.xlane.f32.xlu0 %v406_v1  ;;  %641 = vmatpush.bf16.msra.mxu2 %v1826_v22  ;;  %v2089_v36 = vld [vmem:[#allocation2 + $0x64] sm:$0xf]  ;;  %v1794_v37 = vor.u32 %v2090_v35, %v1793_v34  ;;  %v1801_v39 = vld [vmem:[#allocation2 + $0x68] sm:$0xf]  ;;  %v2091_v40 = vld [vmem:[#allocation2 + $0x70] sm:$0xf0] }
  0x27   : > { %v1798_v41 = vor.u32 %v2089_v36, %v1795_v38  ;;  %v1802_v42 = vor.u32 %v2091_v40, %v1801_v39  ;;  %v414_v43 = vsub.f32 1.0, %v413_v33  ;;  %v1781_v44 = vld [vmem:[#allocation2 + $0x48] sm:$0xf]  ;;  %v2087_v45 = vld [vmem:[#allocation2 + $0x50] sm:$0xf0]  ;;  %vm1009_vm12 = vcmask 523264  }
  0x28   : > { %614 = vmatpush.bf16.msra.mxu0 %v1806_v27  ;;  %v2086_v46 = vld [vmem:[#allocation2 + $0x4c] sm:$0xf]  ;;  %v1782_v47 = vor.u32 %v2087_v45, %v1781_v44  ;;  %v1783_v48 = vld [vmem:[#allocation2 + $0x54] sm:$0xf0]  ;;  %v1789_v49 = vld [vmem:[#allocation2 + $0x50] sm:$0xf] }
  0x29   : > { %628 = vmatpush.bf16.msra.mxu1 %v1810_v31  ;;  %v2088_v50 = vld [vmem:[#allocation2 + $0x58] sm:$0xf0]  ;;  %v1786_v51 = vor.u32 %v2086_v46, %v1783_v48  ;;  %v415_v53 = vmul.f32 %v2579_v23, %v414_v43  ;;  %v1769_v54 = vld [vmem:[#allocation2 + $0x30] sm:$0xf]  ;;  %v2083_v56 = vld [vmem:[#allocation2 + $0x34] sm:$0xf] }
  0x2a   : > { %642 = vmatpush.bf16.msra.mxu2 %v1814_v32  ;;  %v1790_v52 = vor.u32 %v2088_v50, %v1789_v49  ;;  %v2084_v55 = vld [vmem:[#allocation2 + $0x38] sm:$0xf0]  ;;  %v1771_v58 = vld [vmem:[#allocation2 + $0x3c] sm:$0xf0]  ;;  %v1777_v59 = vld [vmem:[#allocation2 + $0x38] sm:$0xf] }
  0x2b   : > { %v1770_v57 = vor.u32 %v2084_v55, %v1769_v54  ;;  %v2085_v60 = vld [vmem:[#allocation2 + $0x40] sm:$0xf0]  ;;  %v1774_v61 = vor.u32 %v2083_v56, %v1771_v58  ;;  %v416_v63 = vadd.f32 %v2579_v23, %v415_v53  ;;  %v1757_v1 = vld [vmem:[#allocation2 + $0x18] sm:$0xf]  ;;  %v2080_v4 = vld [vmem:[#allocation2 + $0x1c] sm:$0xf] }
  0x2c   : > { %615 = vmatpush.bf16.msra.mxu0 %v1794_v37  ;;  %v1778_v62 = vor.u32 %v2085_v60, %v1777_v59  ;;  %v1759_v6 = vld [vmem:[#allocation2 + $0x24] sm:$0xf0]  ;;  %v1765_v7 = vld [vmem:[#allocation2 + $0x20] sm:$0xf]  ;;  %v2082_v8 = vld [vmem:[#allocation2 + $0x28] sm:$0xf0]  ;;  %v658_v60 = vlaneseq }
  0x2d   : > { %629 = vmatpush.bf16.msra.mxu1 %v1798_v41  ;;  %v1762_v9 = vor.u32 %v2080_v4, %v1759_v6  ;;  %v1766_v10 = vor.u32 %v2082_v8, %v1765_v7  ;;  %v2586_v11 = vsel %vm417_vm0, %v2579_v23, %v416_v63  ;;  %v1745_v12 = vld [vmem:[#allocation2] sm:$0xf]  ;;  %v2078_v13 = vld [vmem:[#allocation2 + $0x8] sm:$0xf0]  ;;  %v2077_v14 = vld [vmem:[#allocation2 + $0x4] sm:$0xf] }
  0x2e   : > { %410 = vadd.xlane.f32.xlu0 %v407_v3  ;;  %643 = vmatpush.bf16.msra.mxu2 %v1802_v42  ;;  %v2081_v3 = vld [vmem:[#allocation2 + $0x20] sm:$0xf0]  ;;  %v1746_v15 = vor.u32 %v2078_v13, %v1745_v12  ;;  %v1747_v16 = vld [vmem:[#allocation2 + $0xc] sm:$0xf0]  ;;  %v1753_v17 = vld [vmem:[#allocation2 + $0x8] sm:$0xf] }
  0x2f   : > { %v1758_v5 = vor.u32 %v2081_v3, %v1757_v1  ;;  %v2079_v18 = vld [vmem:[#allocation2 + $0x10] sm:$0xf0]  ;;  %v1750_v20 = vor.u32 %v2077_v14, %v1747_v16  ;;  %v2234_v41 = vld [vmem:[%s2741_s1] ss:$0 sm:$0xff]  ;;  %vm1012_vm13 = vcmask 785408  }
  0x30   : > { %616 = vmatpush.bf16.msra.mxu0 %v1782_v47  ;;  %v1754_v21 = vor.u32 %v2079_v18, %v1753_v17  ;;  %v656_v47 = vld [vmem:[%s2748_s8] sm:$0xff] }
  0x31   : > { %630 = vmatpush.bf16.msra.mxu1 %v1786_v51  ;;  %v654_v4 = vld [vmem:[%s2747_s7] sm:$0xff] }
  0x32   : > { %644 = vmatpush.bf16.msra.mxu2 %v1790_v52  ;;  %v657_v52 = vld [vmem:[%s2748_s8 + $0x8] sm:$0xff] }
  0x34   : > { %617 = vmatpush.bf16.msra.mxu0 %v1770_v57 }
  0x35   : > { %631 = vmatpush.bf16.msra.mxu1 %v1774_v61  ;;  %v659_v61 = vand.u32 127, %v658_v60 }
  0x36   : > { %645 = vmatpush.bf16.msra.mxu2 %v1778_v62 }
  0x37   : > { %v664_v63 = vand.u32 31, %v659_v61 }
  0x38   : > { %618 = vmatpush.bf16.msra.mxu0 %v1758_v5  ;;  %v655_v5 = vld [vmem:[%s2747_s7 + $0x8] sm:$0xff] }
  0x39   : > { %632 = vmatpush.bf16.msra.mxu1 %v1762_v9  ;;  %vm2604_vm7 = vcmp.lt.s32.totalorder %v664_v63, 16 }
  0x3a   : > { %646 = vmatpush.bf16.msra.mxu2 %v1766_v10 }
  0x3c   : > { %619 = vmatpush.bf16.msra.mxu0 %v1746_v15 }
  0x3d   : > { %633 = vmatpush.bf16.msra.mxu1 %v1750_v20 }
  0x3e   : > { %647 = vmatpush.bf16.msra.mxu2 %v1754_v21 }
  0x99   : > { %v409_v19 = vpop.xlane.xlu0 %408 }
  0x9a   : > { %v419_v22 = vmul.f32 %v2586_v11, %v409_v19 }
  0x9c   : > { %v421_v24 = vadd.f32 1e-05, %v419_v22 }
  0x9e   : > { %2238 = vrsqrt.f32 %v421_v24  ;;  %vm429_vm2 = vweird.f32 %v421_v24 }
  0xa1   : > { %v411_v23 = vpop.xlane.xlu0 %410 }
  0xa2   : > { %v420_v25 = vmul.f32 %v2586_v11, %v411_v23 }
  0xa4   : > { %v2239_v26 = vpop.eup %2238  ;;  %v422_v27 = vadd.f32 1e-05, %v420_v25 }
  0xa5   : > { %v424_v28 = vmul.f32 %v2239_v26, %v421_v24  ;;  %vm430_vm1 = vweird.f32 %v2239_v26 }
  0xa6   : > { %2240 = vrsqrt.f32 %v422_v27  ;;  %vm431_vm3 = vmor %vm429_vm2, %vm430_vm1  ;;  %vm439_vm5 = vweird.f32 %v422_v27 }
  0xa7   : > { %v425_v29 = vmul.f32 %v2239_v26, %v424_v28 }
  0xa9   : > { %v426_v30 = vmul.f32 0.5, %v425_v29 }
  0xab   : > { %v427_v31 = vsub.f32 1.5, %v426_v30  ;;  %v708_v30 = vshrl.u32 %v658_v60, 7 }
  0xac   : > { %v2241_v32 = vpop.eup %2240 }
  0xad   : > { %v434_v33 = vmul.f32 %v2241_v32, %v422_v27  ;;  %v428_v34 = vmul.f32 %v2239_v26, %v427_v31  ;;  %vm440_vm4 = vweird.f32 %v2241_v32  ;;  %vm710_vm9 = vcmp.ge.s32.totalorder %v708_v30, %v659_v61 }
  0xae   : > { %vm441_vm6 = vmor %vm439_vm5, %vm440_vm4  ;;  %v2447_v31 = vmov -1e+30  }
  0xaf   : > { %v435_v35 = vmul.f32 %v2241_v32, %v434_v33  ;;  %v432_v37 = vsel %vm431_vm3, %v2239_v26, %v428_v34  ;;  %v709_v33 = vadd.s32 8, %v708_v30 }
  0xb0   : > { %v443_v40 = vmul.f32 %v432_v37, %v2571_v0 }
  0xb1   : > { %v436_v36 = vmul.f32 0.5, %v435_v35  ;;  %vm711_vm11 = vcmp.ge.s32.totalorder %v709_v33, %v659_v61 }
  0xb2   : > { %v449_v44 = vmul.f32 %v2234_v41, %v443_v40  ;;  %v2628_v37 = vsel %vm711_vm11, 0.0, %v2447_v31 }
  0xb3   : > { %v437_v38 = vsub.f32 1.5, %v436_v36 }
  0xb5   : > { %v438_v39 = vmul.f32 %v2241_v32, %v437_v38 }
  0xb7   : > { %v442_v42 = vsel %vm441_vm6, %v2241_v32, %v438_v39  ;;  %v2624_v32 = vsel %vm710_vm9, 0.0, %v2447_v31 }
  0xb8   : > { %v444_v43 = vmul.f32 %v442_v42, %v2575_v2 }
  0xba   : > { %v450_v45 = vmul.f32 %v2234_v41, %v444_v43 }
  0xbc   : > { %v451_v46 = vpack.c.bf16 %v450_v45, %v449_v44 }
  0xbe   : > { %620 = vmatmul.bf16.vlgmr.msra.gmra.mxu0 %v451_v46  ;;  %634 = vmatmul.bf16.vlgmr.msra.gmra.mxu1 %v451_v46 }
  0xbf   : > { %648 = vmatmul.bf16.vlgmr.msra.gmra.mxu2 %v451_v46 }
 0x13b   : > { %v621_v48 = vpop.f32.mrf.mxu0  ;;  %v635_v49 = vpop.f32.mrf.mxu1 }
 0x13c   : > { %v675_v50 = vmul.f32 %v656_v47, %v621_v48  ;;  %v693_v51 = vmul.f32 %v656_v47, %v635_v49  ;;  %v691_v7 = vmul.f32 %v654_v4, %v635_v49  ;;  %v673_v21 = vmul.f32 %v654_v4, %v621_v48 }
 0x13e   : > { %699 = vrot.lane.b32.xlu2 %v693_v51, %s2445_s29  ;;  %695 = vrot.lane.b32.xlu1 %v693_v51, %s2446_s10 }
 0x13f   : > { %677 = vrot.lane.b32.xlu0 %v675_v50, %s2446_s10 }
 0x142   : > { %v649_v53 = vpop.f32.mrf.mxu2 }
 0x143   : > { %v637_v54 = vpop.f32.mrf.mxu1  ;;  %v623_v56 = vpop.f32.mrf.mxu0 }
 0x144   : > { %v694_v55 = vmul.f32 %v657_v52, %v637_v54  ;;  %v676_v59 = vmul.f32 %v657_v52, %v623_v56  ;;  %v692_v8 = vmul.f32 %v655_v5, %v637_v54  ;;  %v674_v22 = vmul.f32 %v655_v5, %v623_v56 }
 0x146   : > { %701 = vrot.lane.b32.xlu2 %v694_v55, %s2445_s29  ;;  %697 = vrot.lane.b32.xlu1 %v694_v55, %s2446_s10 }
 0x14a   : > { %v651_v57 = vpop.f32.mrf.mxu2 }
 0x14b   : > { %v2601_v58 = vpack.c.bf16 %v651_v57, %v649_v53 }
 0x14d   : > { %772 = vmatpush.bf16.msra.mxu3 %v2601_v58 }
 0x14e   : > { %681 = vrot.lane.b32.xlu2 %v675_v50, %s2445_s29  ;;  %679 = vrot.lane.b32.xlu1 %v676_v59, %s2446_s10 }
 0x156   : > { %683 = vrot.lane.b32.xlu1 %v676_v59, %s2445_s29 }
 0x198   : > { %v700_v62 = vpop.permute.xlu2 %699 }
 0x1a0   : > { %v702_v9 = vpop.permute.xlu2 %701 }
 0x1a8   : > { %v682_v19 = vpop.permute.xlu2 %681 }
 0x1b0   : > { %v696_v1 = vpop.permute.xlu1 %695 }
 0x1b1   : > { %v703_v6 = vsel %vm2604_vm7, %v696_v1, %v700_v62  ;;  %v678_v18 = vpop.permute.xlu0 %677 }
 0x1b2   : > { %v705_v13 = vadd.f32 %v703_v6, %v691_v7  ;;  %v685_v20 = vsel %vm2604_vm7, %v678_v18, %v682_v19 }
 0x1b3   : > { %v687_v24 = vadd.f32 %v685_v20, %v673_v21 }
 0x1b5   : > { %v689_v27 = vmul.f32 0.17677669, %v687_v24 }
 0x1b8   : > { %v698_v10 = vpop.permute.xlu1 %697 }
 0x1b9   : > { %v704_v12 = vsel %vm2604_vm7, %v698_v10, %v702_v9 }
 0x1ba   : > { %v706_v14 = vadd.f32 %v704_v12, %v692_v8 }
 0x1bc   : > { %v715_v15 = vpack.c.bf16 %v706_v14, %v705_v13 }
 0x1be   : > { %v721_v16 = vsel %vm716_vm8, %v715_v15, 0 }
 0x1bf   : > { %730 = vmatpush.bf16.xpose.msrb.mxu0 %v721_v16 }
 0x1c0   : > { %v680_v17 = vpop.permute.xlu1 %679 }
 0x1c8   : > { %v684_v23 = vpop.permute.xlu1 %683 }
 0x1c9   : > { %v686_v25 = vsel %vm2604_vm7, %v680_v17, %v684_v23 }
 0x1ca   : > { %v688_v26 = vadd.f32 %v686_v25, %v674_v22 }
 0x1cc   : > { %v690_v28 = vmul.f32 0.17677669, %v688_v26 }
 0x1ce   : > { %v714_v29 = vpack.c.bf16 %v690_v28, %v689_v27 }
 0x1d0   : > { %1839 = vmatmul.msk.bf16.vlgmr.msrb.gmra.mxu0 %vm716_vm8, %v714_v29 }
 0x24d   : > { %v732_v34 = vpop.f32.mrf.mxu0 }
 0x24e   : > { %v733_v35 = vadd.f32 %v732_v34, %v2624_v32 }
 0x250   : > { %v738_v36 = vsel %vm737_vm10, %v733_v35, -inf }
 0x251   : > { %739 = vmax.xlane.f32.xlu2 %v738_v36 }
 0x255   : > { %v734_v38 = vpop.f32.mrf.mxu0 }
 0x256   : > { %v735_v39 = vadd.f32 %v734_v38, %v2628_v37 }
 0x258   : > { %v741_v40 = vsel %vm737_vm10, %v735_v39, -inf }
 0x259   : > { %742 = vmax.xlane.f32.xlu1 %v741_v40 }
 0x269   : > { %783 = vrot.lane.b32.xlu2 %v715_v15, %s2448_s17 }
 0x272   : > { %780 = vrot.lane.b32.xlu1 %v714_v29, %s2448_s17 }
 0x27a   : > { %916 = vrot.lane.b32.xlu1 %v714_v29, %s2449_s26 }
 0x2c4   : > { %v740_v41 = vpop.xlane.xlu2 %739 }
 0x2c5   : > { %v744_v42 = vsub.f32 %v733_v35, %v740_v41 }
 0x2c7   : > { %v746_v43 = vmul.f32 1.442695, %v744_v42 }
 0x2c9   : > { %2242 = vpow2.f32 %v746_v43 }
 0x2cc   : > { %v743_v44 = vpop.xlane.xlu1 %742  ;;  %v784_v45 = vpop.permute.xlu2 %783 }
 0x2cd   : > { %v745_v46 = vsub.f32 %v735_v39, %v743_v44  ;;  %v789_v47 = vsel %vm716_vm8, %v784_v45, 0 }
 0x2ce   : > { %798 = vmatpush.bf16.xpose.msrb.mxu3 %v789_v47 }
 0x2cf   : > { %v2243_v48 = vpop.eup %2242  ;;  %v748_v49 = vmul.f32 1.442695, %v745_v46 }
 0x2d0   : > { %v750_v50 = vsel %vm737_vm10, %v2243_v48, 0.0 }
 0x2d1   : > { %2244 = vpow2.f32 %v748_v49  ;;  %751 = vadd.xlane.f32.xlu0 %v750_v50 }
 0x2d7   : > { %v2245_v51 = vpop.eup %2244 }
 0x2d8   : > { %v753_v52 = vsel %vm737_vm10, %v2245_v51, 0.0 }
 0x2d9   : > { %754 = vadd.xlane.f32.xlu2 %v753_v52 }
 0x2e4   : > { %v781_v4 = vpop.permute.xlu1 %780 }
 0x2e5   : > { %851 = vrot.lane.b32.xlu0 %v715_v15, %s2450_s13 }
 0x2ec   : > { %v917_v5 = vpop.permute.xlu1 %916 }
 0x2ed   : > { %849 = vrot.lane.b32.xlu0 %v714_v29, %s2450_s13 }
 0x2f1   : > { %918 = vrot.lane.b32.xlu2 %v715_v15, %s2449_s26 }
 0x344   : > { %v752_v53 = vpop.xlane.xlu0 %751 }
 0x345   : > { %2246 = vrcp.f32 %v752_v53 }
 0x34b   : > { %v2247_v55 = vpop.eup %2246 }
 0x34c   : > { %v755_v54 = vpop.xlane.xlu2 %754  ;;  %v758_v57 = vmul.f32 %v2247_v55, %v2243_v48 }
 0x34d   : > { %2248 = vrcp.f32 %v755_v54 }
 0x353   : > { %v2249_v56 = vpop.eup %2248 }
 0x354   : > { %v759_v59 = vmul.f32 %v2249_v56, %v2245_v51  ;;  %v919_v60 = vpop.permute.xlu2 %918 }
 0x355   : > { %v924_v63 = vsel %vm716_vm8, %v919_v60, 0 }
 0x356   : > { %v760_v61 = vpack.c.bf16 %v759_v59, %v758_v57 }
 0x357   : > { %v852_v62 = vpop.permute.xlu0 %851 }
 0x358   : > { %1840 = vmatmul.msk.bf16.vlgmr.msra.gmra.mxu3 %vm737_vm10, %v760_v61  ;;  %v857_v1 = vsel %vm716_vm8, %v852_v62, 0 }
 0x359   : > { %933 = vmatpush.bf16.xpose.msra.mxu3 %v924_v63  ;;  %866 = vmatpush.bf16.xpose.msrb.mxu1 %v857_v1 }
 0x35f   : > { %v850_v3 = vpop.permute.xlu0 %849 }
 0x360   : > { %1843 = vmatmul.msk.bf16.vlgmr.msrb.gmra.mxu1 %vm716_vm8, %v850_v3 }
 0x368   : > { %1841 = vmatmul.msk.bf16.vlgmr.msrb.gmra.mxu3 %vm716_vm8, %v781_v4 }
 0x378   : > { %1845 = vmatmul.msk.bf16.vlgmr.msra.gmra.mxu3 %vm716_vm8, %v917_v5 }
 0x3db   : > { %v2647_v6 = vpop.f32.mrf.mxu3 }
 0x3dd   : > { %v868_v7 = vpop.f32.mrf.mxu1 }
 0x3de   : > { %v869_v8 = vadd.f32 %v868_v7, %v2624_v32 }
 0x3e0   : > { %v873_v9 = vsel %vm737_vm10, %v869_v8, -inf }
 0x3e1   : > { %874 = vmax.xlane.f32.xlu1 %v873_v9 }
 0x3e3   : > { %v2651_v10 = vpop.f32.mrf.mxu3 }
 0x3e5   : > { %v870_v15 = vpop.f32.mrf.mxu1 }
 0x3e6   : > { %v871_v16 = vadd.f32 %v870_v15, %v2628_v37 }
 0x3e8   : > { %v876_v20 = vsel %vm737_vm10, %v871_v16, -inf }
 0x3eb   : > { %v800_v12 = vpop.f32.mrf.mxu3 }
 0x3ec   : > { %v801_v13 = vadd.f32 %v800_v12, %v2624_v32 }
 0x3ee   : > { %v805_v14 = vsel %vm737_vm10, %v801_v13, -inf }
 0x3ef   : > { %806 = vmax.xlane.f32.xlu2 %v805_v14 }
 0x3f3   : > { %v802_v17 = vpop.f32.mrf.mxu3 }
 0x3f4   : > { %v803_v18 = vadd.f32 %v802_v17, %v2628_v37 }
 0x3f6   : > { %v808_v19 = vsel %vm737_vm10, %v803_v18, -inf }
 0x3f7   : > { %809 = vmax.xlane.f32.xlu0 %v808_v19  ;;  %877 = vmax.xlane.f32.xlu2 %v876_v20 }
 0x3fb   : > { %v935_v21 = vpop.f32.mrf.mxu3 }
 0x3fc   : > { %v936_v22 = vadd.f32 %v935_v21, %v2624_v32 }
 0x3fe   : > { %v940_v24 = vsel %vm737_vm10, %v936_v22, -inf }
 0x3ff   : > { %941 = vmax.xlane.f32.xlu0 %v940_v24 }
 0x403   : > { %v937_v23 = vpop.f32.mrf.mxu3 }
 0x404   : > { %v938_v25 = vadd.f32 %v937_v23, %v2628_v37  ;;  %v2107_v23 = vld [vmem:[#allocation4 + $0x30] sm:$0xff] }
 0x406   : > { %v943_v26 = vsel %vm737_vm10, %v938_v25, -inf }
 0x407   : > { %944 = vmax.xlane.f32.xlu1 %v943_v26  ;;  %v2106_v26 = vld [vmem:[#allocation4 + $0x28] sm:$0xff] }
 0x420   : > { %829 = vrot.lane.b32.xlu1 %v2601_v58, %s2448_s17 }
 0x454   : > { %v875_v27 = vpop.xlane.xlu1 %874 }
 0x455   : > { %v879_v28 = vsub.f32 %v869_v8, %v875_v27 }
 0x457   : > { %v881_v29 = vmul.f32 1.442695, %v879_v28 }
 0x459   : > { %2250 = vpow2.f32 %v881_v29 }
 0x45f   : > { %v2251_v30 = vpop.eup %2250 }
 0x460   : > { %v885_v31 = vsel %vm737_vm10, %v2251_v30, 0.0 }
 0x461   : > { %886 = vadd.xlane.f32.xlu2 %v885_v31 }
 0x462   : > { %v807_v32 = vpop.xlane.xlu2 %806 }
 0x463   : > { %v811_v33 = vsub.f32 %v801_v13, %v807_v32 }
 0x465   : > { %v813_v34 = vmul.f32 1.442695, %v811_v33 }
 0x467   : > { %2252 = vpow2.f32 %v813_v34  ;;  %v2105_v34 = vld [vmem:[#allocation4 + $0x20] sm:$0xff] }
 0x46a   : > { %v810_v35 = vpop.xlane.xlu0 %809  ;;  %v878_v36 = vpop.xlane.xlu2 %877 }
 0x46b   : > { %v880_v37 = vsub.f32 %v871_v16, %v878_v36  ;;  %v812_v40 = vsub.f32 %v803_v18, %v810_v35  ;;  %v2104_v35 = vld [vmem:[#allocation4 + $0x18] sm:$0xff]  ;;  %v2103_v36 = vld [vmem:[#allocation4 + $0x10] sm:$0xff] }
 0x46d   : > { %v2253_v38 = vpop.eup %2252  ;;  %v883_v39 = vmul.f32 1.442695, %v880_v37  ;;  %v815_v42 = vmul.f32 1.442695, %v812_v40  ;;  %v2102_v37 = vld [vmem:[#allocation4 + $0x8] sm:$0xff] }
 0x46e   : > { %v817_v41 = vsel %vm737_vm10, %v2253_v38, 0.0 }
 0x46f   : > { %818 = vadd.xlane.f32.xlu2 %v817_v41  ;;  %2254 = vpow2.f32 %v883_v39 }
 0x470   : > { %2256 = vpow2.f32 %v815_v42 }
 0x472   : > { %v942_v43 = vpop.xlane.xlu0 %941 }
 0x473   : > { %v946_v44 = vsub.f32 %v936_v22, %v942_v43  ;;  %v2108_v22 = vld [vmem:[#allocation4 + $0x38] sm:$0xff] }
 0x474   : > { %1080 = vmatpush.bf16.msra.mxu1 %v2108_v22  ;;  %v1961_v22 = vld [vmem:[#allocation6 + $0xa0] sm:$0xf] }
 0x475   : > { %v948_v45 = vmul.f32 1.442695, %v946_v44  ;;  %v2255_v46 = vpop.eup %2254 }
 0x476   : > { %v888_v47 = vsel %vm737_vm10, %v2255_v46, 0.0  ;;  %v2257_v50 = vpop.eup %2256 }
 0x477   : > { %2258 = vpow2.f32 %v948_v45  ;;  %889 = vadd.xlane.f32.xlu0 %v888_v47  ;;  %v820_v54 = vsel %vm737_vm10, %v2257_v50, 0.0 }
 0x478   : > { %1081 = vmatpush.bf16.msra.mxu1 %v2107_v23  ;;  %v2129_v23 = vld [vmem:[#allocation6 + $0xa4] sm:$0xf] }
 0x47a   : > { %v945_v48 = vpop.xlane.xlu1 %944 }
 0x47b   : > { %v947_v49 = vsub.f32 %v938_v25, %v945_v48 }
 0x47c   : > { %1082 = vmatpush.bf16.msra.mxu1 %v2106_v26  ;;  %v1963_v26 = vld [vmem:[#allocation6 + $0xb0] sm:$0xf0] }
 0x47d   : > { %v2259_v51 = vpop.eup %2258  ;;  %v950_v52 = vmul.f32 1.442695, %v947_v49 }
 0x47e   : > { %v952_v53 = vsel %vm737_vm10, %v2259_v51, 0.0 }
 0x47f   : > { %2260 = vpow2.f32 %v950_v52  ;;  %953 = vadd.xlane.f32.xlu2 %v952_v53  ;;  %821 = vadd.xlane.f32.xlu0 %v820_v54 }
 0x480   : > { %1083 = vmatpush.bf16.msra.mxu1 %v2105_v34  ;;  %v1945_v34 = vld [vmem:[#allocation6 + $0x80] sm:$0xf] }
 0x484   : > { %1084 = vmatpush.bf16.msra.mxu1 %v2104_v35  ;;  %v2127_v35 = vld [vmem:[#allocation6 + $0x8c] sm:$0xf0] }
 0x485   : > { %v2261_v55 = vpop.eup %2260 }
 0x486   : > { %v955_v56 = vsel %vm737_vm10, %v2261_v55, 0.0 }
 0x487   : > { %956 = vadd.xlane.f32.xlu0 %v955_v56 }
 0x488   : > { %1085 = vmatpush.bf16.msra.mxu1 %v2103_v36  ;;  %v2125_v36 = vld [vmem:[#allocation6 + $0x84] sm:$0xf] }
 0x48c   : > { %1086 = vmatpush.bf16.msra.mxu1 %v2102_v37  ;;  %v1946_v37 = vor.u32 %v2127_v35, %v1945_v34 }
 0x492   : > { %v830_v57 = vpop.permute.xlu1 %829 }
 0x493   : > { %842 = vmatpush.bf16.msra.mxu0 %v830_v57 }
 0x497   : > { %896 = vrot.lane.b32.xlu2 %v2601_v58, %s2450_s13 }
 0x49b   : > { %963 = vrot.lane.b32.xlu0 %v2601_v58, %s2449_s26 }
 0x4d4   : > { %v887_v59 = vpop.xlane.xlu2 %886 }
 0x4e2   : > { %v819_v60 = vpop.xlane.xlu2 %818 }
 0x4ea   : > { %v890_v61 = vpop.xlane.xlu0 %889 }
 0x4eb   : > { %2262 = vrcp.f32 %v890_v61  ;;  %v2139_v61 = vld [vmem:[#allocation6 + $0xec] sm:$0xf0] }
 0x4ec   : > { %2264 = vrcp.f32 %v887_v59 }
 0x4ed   : > { %2266 = vrcp.f32 %v819_v60  ;;  %v1993_v60 = vld [vmem:[#allocation6 + $0xe0] sm:$0xf] }
 0x4f1   : > { %v2263_v1 = vpop.eup %2262 }
 0x4f2   : > { %v954_v62 = vpop.xlane.xlu2 %953  ;;  %v822_v63 = vpop.xlane.xlu0 %821  ;;  %v894_v5 = vmul.f32 %v2263_v1, %v2255_v46  ;;  %v1995_v1 = vld [vmem:[#allocation6 + $0xf0] sm:$0xf0] }
 0x4f3   : > { %2268 = vrcp.f32 %v822_v63  ;;  %v2265_v3 = vpop.eup %2264  ;;  %v1994_v63 = vor.u32 %v2139_v61, %v1993_v60  ;;  %v2119_v60 = vld [vmem:[#allocation6 + $0x4c] sm:$0xf0]  ;;  %v2117_v61 = vld [vmem:[#allocation6 + $0x44] sm:$0xf] }
 0x4f4   : > { %v2267_v4 = vpop.eup %2266  ;;  %v893_v8 = vmul.f32 %v2265_v3, %v2251_v30  ;;  %v2001_v3 = vld [vmem:[#allocation6 + $0xe8] sm:$0xf] }
 0x4f5   : > { %v825_v12 = vmul.f32 %v2267_v4, %v2253_v38  ;;  %v2101_v38 = vld [vmem:[#allocation4] sm:$0xff] }
 0x4f6   : > { %v895_v58 = vpack.c.bf16 %v894_v5, %v893_v8  ;;  %1087 = vmatpush.bf16.msra.mxu1 %v2101_v38  ;;  %v2003_v8 = vld [vmem:[#allocation6 + $0xf8] sm:$0xf0]  ;;  %v1947_v38 = vld [vmem:[#allocation6 + $0x90] sm:$0xf0] }
 0x4f9   : > { %v2269_v7 = vpop.eup %2268 }
 0x4fa   : > { %v897_v9 = vpop.permute.xlu2 %896  ;;  %v826_v13 = vmul.f32 %v2269_v7, %v2257_v50  ;;  %v957_v15 = vpop.xlane.xlu0 %956  ;;  %v2138_v7 = vld [vmem:[#allocation6 + $0xec] sm:$0xf] }
 0x4fb   : > { %909 = vmatpush.bf16.msrb.mxu2 %v897_v9  ;;  %2270 = vrcp.f32 %v957_v15  ;;  %v2006_v9 = vor.u32 %v2138_v7, %v2003_v8  ;;  %v1985_v15 = vld [vmem:[#allocation6 + $0xc8] sm:$0xf]  ;;  %v1923_v7 = vld [vmem:[#allocation6 + $0x58] sm:$0xf0] }
 0x4fc   : > { %v827_v14 = vpack.c.bf16 %v826_v13, %v825_v12  ;;  %2272 = vrcp.f32 %v954_v62  ;;  %v2137_v62 = vld [vmem:[#allocation6 + $0xe4] sm:$0xf]  ;;  %v2135_v12 = vld [vmem:[#allocation6 + $0xcc] sm:$0xf0] }
 0x4fd   : > { %v1998_v4 = vor.u32 %v2137_v62, %v1995_v1  ;;  %v2133_v13 = vld [vmem:[#allocation6 + $0xc4] sm:$0xf]  ;;  %1369 = vmatpush.bf16.msrb.mxu1 %v2006_v9  ;;  %v1921_v1 = vld [vmem:[#allocation6 + $0x48] sm:$0xf]  ;;  %v1897_v9 = vld [vmem:[#allocation6 + $0x20] sm:$0xf] }
 0x4fe   : > { %1844 = vmatmul.msk.bf16.vlgmr.msrb.gmra.mxu2 %vm737_vm10, %v895_v58  ;;  %1842 = vmatmul.msk.bf16.vlgmr.msra.gmra.mxu0 %vm737_vm10, %v827_v14  ;;  %v1979_v14 = vld [vmem:[#allocation6 + $0xd0] sm:$0xf0] }
 0x4ff   : > { %1327 = vmatpush.bf16.msra.mxu2 %v1994_v63  ;;  %1341 = vmatpush.bf16.msrb.mxu3 %v1998_v4  ;;  %v1915_v63 = vld [vmem:[#allocation6 + $0x50] sm:$0xf0] }
 0x501   : > { %v2271_v16 = vpop.eup %2270 }
 0x502   : > { %v2273_v17 = vpop.eup %2272  ;;  %v961_v18 = vmul.f32 %v2271_v16, %v2261_v55  ;;  %v2136_v16 = vld [vmem:[#allocation6 + $0xd4] sm:$0xf0] }
 0x503   : > { %v960_v19 = vmul.f32 %v2273_v17, %v2259_v51  ;;  %v1982_v17 = vor.u32 %v2133_v13, %v1979_v14  ;;  %v1905_v14 = vld [vmem:[#allocation6 + $0x28] sm:$0xf] }
 0x505   : > { %v962_v21 = vpack.c.bf16 %v961_v18, %v960_v19  ;;  %v1986_v18 = vor.u32 %v2136_v16, %v1985_v15  ;;  %v2134_v19 = vld [vmem:[#allocation6 + $0xcc] sm:$0xf]  ;;  %1342 = vmatpush.bf16.msrb.mxu3 %v1982_v17  ;;  %v2116_v15 = vld [vmem:[#allocation6 + $0x34] sm:$0xf0] }
 0x506   : > { %v1906_v17 = vor.u32 %v2116_v15, %v1905_v14  ;;  %v2150_v14 = vld [vmem:[#allocation7 + $0x48] sm:$0xff] }
 0x50d   : > { %v964_v20 = vpop.permute.xlu0 %963 }
 0x50e   : > { %976 = vmatpush.bf16.msrb.mxu0 %v964_v20  ;;  %v1987_v20 = vld [vmem:[#allocation6 + $0xd8] sm:$0xf0] }
 0x511   : > { %1846 = vmatmul.msk.bf16.vlgmr.msrb.gmra.mxu0 %vm737_vm10, %v962_v21  ;;  %v1990_v21 = vor.u32 %v2134_v19, %v1987_v20  ;;  %v1907_v19 = vld [vmem:[#allocation6 + $0x38] sm:$0xf0] }
 0x513   : > { %1370 = vmatpush.bf16.msrb.mxu1 %v1990_v21  ;;  %v1881_v21 = vld [vmem:[#allocation6] sm:$0xf] }
 0x57b   : > { %v844_v24 = vpop.f32.mrf.mxu0 }
 0x581   : > { %v911_v25 = vpop.f32.mrf.mxu2 }
 0x583   : > { %v846_v27 = vpop.f32.mrf.mxu0 }
 0x584   : > { %v2224_v31 = vpack.i.bf16 %v846_v27, %v844_v24  ;;  %v2131_v24 = vld [vmem:[#allocation6 + $0xac] sm:$0xf0]  ;;  %v1969_v27 = vld [vmem:[#allocation6 + $0xa8] sm:$0xf] }
 0x589   : > { %v913_v28 = vpop.f32.mrf.mxu2 }
 0x58a   : > { %v2219_v29 = vpack.i.bf16 %v913_v28, %v911_v25  ;;  %v1962_v25 = vor.u32 %v2131_v24, %v1961_v22  ;;  %v2132_v28 = vld [vmem:[#allocation6 + $0xb4] sm:$0xf0]  ;;  %v2111_v22 = vld [vmem:[#allocation6 + $0xc] sm:$0xf0]  ;;  %v2109_v24 = vld [vmem:[#allocation6 + $0x4] sm:$0xf] }
 0x58c   : > { %2220 = vrot.lane.b32.xlu1 %v2219_v29, %s2450_s13  ;;  %v1966_v29 = vor.u32 %v2129_v23, %v1963_v26  ;;  %v1883_v26 = vld [vmem:[#allocation6 + $0x10] sm:$0xf0] }
 0x58e   : > { %v978_v30 = vpop.f32.mrf.mxu0  ;;  %1343 = vmatpush.bf16.msrb.mxu3 %v1966_v29 }
 0x594   : > { %2225 = vrot.lane.b32.xlu1 %v2224_v31, %s2449_s26  ;;  %v2130_v31 = vld [vmem:[#allocation6 + $0xac] sm:$0xf] }
 0x596   : > { %v980_v32 = vpop.f32.mrf.mxu0 }
 0x597   : > { %v2229_v33 = vpack.i.bf16 %v980_v32, %v978_v30  ;;  %v1970_v30 = vor.u32 %v2132_v28, %v1969_v27  ;;  %v1971_v32 = vld [vmem:[#allocation6 + $0xb8] sm:$0xf0]  ;;  %v1889_v27 = vld [vmem:[#allocation6 + $0x8] sm:$0xf]  ;;  %v2112_v28 = vld [vmem:[#allocation6 + $0x14] sm:$0xf0] }
 0x59c   : > { %2230 = vrot.lane.b32.xlu1 %v2229_v33, %s2448_s17  ;;  %v1974_v33 = vor.u32 %v2130_v31, %v1971_v32  ;;  %v1890_v31 = vor.u32 %v2112_v28, %v1889_v27  ;;  %v2110_v32 = vld [vmem:[#allocation6 + $0xc] sm:$0xf] }
 0x59e   : > { %1371 = vmatpush.bf16.msrb.mxu1 %v1974_v33  ;;  %v1891_v33 = vld [vmem:[#allocation6 + $0x18] sm:$0xf0] }
 0x59f   : > { %v1894_v34 = vor.u32 %v2110_v32, %v1891_v33 }
 0x5fe   : > { %v2221_v39 = vpop.permute.xlu1 %2220 }
 0x5ff   : > { %v2223_v45 = vunpack.i.h.bf16 %v2221_v39  ;;  %v2222_v46 = vunpack.i.l.bf16 %v2221_v39  ;;  %v1953_v39 = vld [vmem:[#allocation6 + $0x88] sm:$0xf] }
 0x606   : > { %v2226_v40 = vpop.permute.xlu1 %2225 }
 0x607   : > { %v2228_v41 = vunpack.i.h.bf16 %v2226_v40  ;;  %v2227_v42 = vunpack.i.l.bf16 %v2226_v40  ;;  %v2128_v40 = vld [vmem:[#allocation6 + $0x94] sm:$0xf0] }
 0x609   : > { %v1008_v43 = vsel %vm716_vm8, %v2651_v10, %v2228_v41  ;;  %v1007_v44 = vsel %vm716_vm8, %v2647_v6, %v2227_v42  ;;  %v1950_v41 = vor.u32 %v2125_v36, %v1947_v38  ;;  %v1954_v42 = vor.u32 %v2128_v40, %v1953_v39 }
 0x60a   : > { %v1010_v50 = vsel %vm1009_vm12, %v1007_v44, %v2222_v46  ;;  %v1011_v51 = vsel %vm1009_vm12, %v1008_v43, %v2223_v45  ;;  %v2126_v43 = vld [vmem:[#allocation6 + $0x8c] sm:$0xf]  ;;  %v1955_v44 = vld [vmem:[#allocation6 + $0x98] sm:$0xf0]  ;;  %v1929_v46 = vld [vmem:[#allocation6 + $0x60] sm:$0xf] }
 0x60b   : > { %v1958_v45 = vor.u32 %v2126_v43, %v1955_v44  ;;  %1344 = vmatpush.bf16.msrb.mxu3 %v1950_v41 }
 0x60d   : > { %1372 = vmatpush.bf16.msrb.mxu1 %v1958_v45 }
 0x60e   : > { %v2231_v47 = vpop.permute.xlu1 %2230 }
 0x60f   : > { %v2233_v48 = vunpack.i.h.bf16 %v2231_v47  ;;  %v2232_v49 = vunpack.i.l.bf16 %v2231_v47  ;;  %v2123_v47 = vld [vmem:[#allocation6 + $0x6c] sm:$0xf0] }
 0x611   : > { %v1013_v52 = vsel %vm1012_vm13, %v1010_v50, %v2232_v49  ;;  %v1014_v53 = vsel %vm1012_vm13, %v1011_v51, %v2233_v48  ;;  %v2121_v48 = vld [vmem:[#allocation6 + $0x64] sm:$0xf]  ;;  %v1930_v49 = vor.u32 %v2123_v47, %v1929_v46  ;;  %v1931_v50 = vld [vmem:[#allocation6 + $0x70] sm:$0xf0]  ;;  %v1937_v51 = vld [vmem:[#allocation6 + $0x68] sm:$0xf] }
 0x612   : > { %v1015_v54 = vpack.c.bf16 %v1014_v53, %v1013_v52  ;;  %v2124_v52 = vld [vmem:[#allocation6 + $0x74] sm:$0xf0]  ;;  %v1934_v53 = vor.u32 %v2121_v48, %v1931_v50 }
 0x614   : > { %1088 = vmatmul.bf16.vlgmr.msra.gmra.mxu1 %v1015_v54  ;;  %v1938_v54 = vor.u32 %v2124_v52, %v1937_v51  ;;  %1345 = vmatpush.bf16.msrb.mxu3 %v1934_v53  ;;  %v2235_v52 = vld [vmem:[%s2744_s4] ss:$0 sm:$0xff] }
 0x691   : > { %v1089_v55 = vpop.f32.mrf.mxu1 }
 0x692   : > { %v2686_v56 = vadd.f32 %v1089_v55, %v2571_v0  ;;  %v2140_v0 = vld [vmem:[#allocation6 + $0xf4] sm:$0xf0]  ;;  %v2122_v55 = vld [vmem:[#allocation6 + $0x6c] sm:$0xf] }
 0x693   : > { %v2002_v5 = vor.u32 %v2140_v0, %v2001_v3  ;;  %v2120_v3 = vld [vmem:[#allocation6 + $0x54] sm:$0xf0]  ;;  %v1918_v0 = vor.u32 %v2117_v61, %v1915_v63  ;;  %v2147_v61 = vld [vmem:[#allocation7 + $0x30] sm:$0xff]  ;;  %v2146_v63 = vld [vmem:[#allocation7 + $0x28] sm:$0xff] }
 0x694   : > { %v1096_v6 = vmul.f32 %v2686_v56, %v2686_v56  ;;  %v1922_v4 = vor.u32 %v2120_v3, %v1921_v1  ;;  %v2154_v1 = vld [vmem:[#allocation7 + $0x68] sm:$0xff]  ;;  %v2145_v3 = vld [vmem:[#allocation7 + $0x20] sm:$0xff] }
 0x695   : > { %1355 = vmatpush.bf16.msra.mxu0 %v2002_v5  ;;  %v2118_v5 = vld [vmem:[#allocation6 + $0x4c] sm:$0xf]  ;;  %1346 = vmatpush.bf16.msrb.mxu3 %v1918_v0  ;;  %v2153_v0 = vld [vmem:[#allocation7 + $0x60] sm:$0xff] }
 0x696   : > { %1098 = vadd.xlane.f32.xlu0 %v1096_v6  ;;  %v1939_v6 = vld [vmem:[#allocation6 + $0x78] sm:$0xf0]  ;;  %v1926_v8 = vor.u32 %v2118_v5, %v1923_v7 }
 0x697   : > { %v2152_v5 = vld [vmem:[#allocation7 + $0x58] sm:$0xff] }
 0x699   : > { %v1091_v10 = vpop.f32.mrf.mxu1  ;;  %1356 = vmatpush.bf16.msra.mxu0 %v1986_v18  ;;  %v2114_v18 = vld [vmem:[#allocation6 + $0x2c] sm:$0xf] }
 0x69a   : > { %v2691_v57 = vadd.f32 %v1091_v10, %v2575_v2  ;;  %v1977_v2 = vld [vmem:[#allocation6 + $0xc0] sm:$0xf]  ;;  %v1942_v10 = vor.u32 %v2122_v55, %v1939_v6  ;;  %v1910_v20 = vor.u32 %v2114_v18, %v1907_v19 }
 0x69b   : > { %v1978_v58 = vor.u32 %v2135_v12, %v1977_v2  ;;  %v2115_v2 = vld [vmem:[#allocation6 + $0x2c] sm:$0xf0]  ;;  %v2113_v12 = vld [vmem:[#allocation6 + $0x24] sm:$0xf] }
 0x69c   : > { %v1097_v59 = vmul.f32 %v2691_v57, %v2691_v57  ;;  %1373 = vmatpush.bf16.msrb.mxu1 %v1942_v10  ;;  %v1898_v13 = vor.u32 %v2115_v2, %v1897_v9 }
 0x69d   : > { %1328 = vmatpush.bf16.msra.mxu2 %v1978_v58  ;;  %1357 = vmatpush.bf16.msra.mxu0 %v1970_v30  ;;  %v1899_v58 = vld [vmem:[#allocation6 + $0x30] sm:$0xf0]  ;;  %v1886_v30 = vor.u32 %v2109_v24, %v1883_v26  ;;  %v2149_v24 = vld [vmem:[#allocation7 + $0x40] sm:$0xff] }
 0x69e   : > { %1100 = vadd.xlane.f32.xlu2 %v1097_v59  ;;  %v1913_v59 = vld [vmem:[#allocation6 + $0x40] sm:$0xf]  ;;  %v1902_v16 = vor.u32 %v2113_v12, %v1899_v58  ;;  %v2143_v12 = vld [vmem:[#allocation7 + $0x10] sm:$0xff]  ;;  %v2142_v58 = vld [vmem:[#allocation7 + $0x8] sm:$0xff] }
 0x69f   : > { %v1914_v62 = vor.u32 %v2119_v60, %v1913_v59  ;;  %v2148_v59 = vld [vmem:[#allocation7 + $0x38] sm:$0xff] }
 0x6a0   : > { %1374 = vmatpush.bf16.msrb.mxu1 %v1926_v8  ;;  %1347 = vmatpush.bf16.msrb.mxu3 %v1902_v16  ;;  %v2156_v60 = vld [vmem:[#allocation7 + $0x78] sm:$0xff] }
 0x6a1   : > { %1329 = vmatpush.bf16.msra.mxu2 %v1962_v25  ;;  %1358 = vmatpush.bf16.msra.mxu0 %v1954_v42  ;;  %v1882_v25 = vor.u32 %v2111_v22, %v1881_v21  ;;  %v2141_v22 = vld [vmem:[#allocation7] sm:$0xff] }
 0x6a4   : > { %1375 = vmatpush.bf16.msrb.mxu1 %v1910_v20  ;;  %1348 = vmatpush.bf16.msrb.mxu3 %v1886_v30 }
 0x6a5   : > { %1330 = vmatpush.bf16.msra.mxu2 %v1946_v37  ;;  %1359 = vmatpush.bf16.msra.mxu0 %v1938_v54 }
 0x6a8   : > { %1376 = vmatpush.bf16.msrb.mxu1 %v1894_v34  ;;  %1611 = vmatpush.bf16.msra.mxu3 %v2156_v60 }
 0x6a9   : > { %1331 = vmatpush.bf16.msra.mxu2 %v1930_v49  ;;  %1360 = vmatpush.bf16.msra.mxu0 %v1922_v4  ;;  %v2144_v4 = vld [vmem:[#allocation7 + $0x18] sm:$0xff] }
 0x6ad   : > { %1332 = vmatpush.bf16.msra.mxu2 %v1914_v62  ;;  %1361 = vmatpush.bf16.msra.mxu0 %v1906_v17  ;;  %v2155_v62 = vld [vmem:[#allocation7 + $0x70] sm:$0xff] }
 0x6ae   : > { %1612 = vmatpush.bf16.msra.mxu3 %v2155_v62 }
 0x6b1   : > { %1333 = vmatpush.bf16.msra.mxu2 %v1898_v13  ;;  %1362 = vmatpush.bf16.msra.mxu0 %v1890_v31  ;;  %v2151_v13 = vld [vmem:[#allocation7 + $0x50] sm:$0xff] }
 0x6b2   : > { %1613 = vmatpush.bf16.msra.mxu3 %v2154_v1 }
 0x6b5   : > { %1334 = vmatpush.bf16.msra.mxu2 %v1882_v25 }
 0x6b6   : > { %1614 = vmatpush.bf16.msra.mxu3 %v2153_v0 }
 0x6b9   : > { %1597 = vmatpush.bf16.msrb.mxu2 %v2148_v59 }
 0x6ba   : > { %1615 = vmatpush.bf16.msra.mxu3 %v2152_v5 }
 0x6bd   : > { %1598 = vmatpush.bf16.msrb.mxu2 %v2147_v61 }
 0x6be   : > { %1616 = vmatpush.bf16.msra.mxu3 %v2151_v13 }
 0x6c1   : > { %1599 = vmatpush.bf16.msrb.mxu2 %v2146_v63 }
 0x6c2   : > { %1617 = vmatpush.bf16.msra.mxu3 %v2150_v14 }
 0x6c5   : > { %1600 = vmatpush.bf16.msrb.mxu2 %v2145_v3 }
 0x6c6   : > { %1618 = vmatpush.bf16.msra.mxu3 %v2149_v24 }
 0x6c9   : > { %1601 = vmatpush.bf16.msrb.mxu2 %v2144_v4 }
 0x6cd   : > { %1602 = vmatpush.bf16.msrb.mxu2 %v2143_v12 }
 0x6d1   : > { %1603 = vmatpush.bf16.msrb.mxu2 %v2142_v58 }
 0x6d5   : > { %1604 = vmatpush.bf16.msrb.mxu2 %v2141_v22 }
 0x709   : > { %v1099_v23 = vpop.xlane.xlu0 %1098 }
 0x70a   : > { %v1102_v29 = vmul.f32 %v1099_v23, %v2586_v11 }
 0x70c   : > { %v1104_v35 = vadd.f32 1e-05, %v1102_v29 }
 0x70e   : > { %2274 = vrsqrt.f32 %v1104_v35  ;;  %vm1112_vm15 = vweird.f32 %v1104_v35 }
 0x711   : > { %v1101_v36 = vpop.xlane.xlu2 %1100 }
 0x712   : > { %v1103_v37 = vmul.f32 %v1101_v36, %v2586_v11 }
 0x714   : > { %v2275_v38 = vpop.eup %2274  ;;  %v1105_v39 = vadd.f32 1e-05, %v1103_v37 }
 0x715   : > { %v1107_v40 = vmul.f32 %v2275_v38, %v1104_v35  ;;  %vm1113_vm14 = vweird.f32 %v2275_v38 }
 0x716   : > { %2276 = vrsqrt.f32 %v1105_v39  ;;  %vm1114_vm0 = vmor %vm1112_vm15, %vm1113_vm14  ;;  %vm1122_vm2 = vweird.f32 %v1105_v39 }
 0x717   : > { %v1108_v41 = vmul.f32 %v2275_v38, %v1107_v40 }
 0x719   : > { %v1109_v42 = vmul.f32 0.5, %v1108_v41 }
 0x71b   : > { %v1110_v43 = vsub.f32 1.5, %v1109_v42 }
 0x71c   : > { %v2277_v44 = vpop.eup %2276 }
 0x71d   : > { %v1117_v45 = vmul.f32 %v2277_v44, %v1105_v39  ;;  %v1111_v46 = vmul.f32 %v2275_v38, %v1110_v43  ;;  %vm1123_vm1 = vweird.f32 %v2277_v44 }
 0x71e   : > { %vm1124_vm3 = vmor %vm1122_vm2, %vm1123_vm1 }
 0x71f   : > { %v1118_v47 = vmul.f32 %v2277_v44, %v1117_v45  ;;  %v1115_v49 = vsel %vm1114_vm0, %v2275_v38, %v1111_v46 }
 0x720   : > { %v1126_v11 = vmul.f32 %v1115_v49, %v2686_v56 }
 0x721   : > { %v1119_v48 = vmul.f32 0.5, %v1118_v47 }
 0x722   : > { %v1132_v55 = vmul.f32 %v2235_v52, %v1126_v11 }
 0x723   : > { %v1120_v50 = vsub.f32 1.5, %v1119_v48 }
 0x725   : > { %v1121_v51 = vmul.f32 %v2277_v44, %v1120_v50 }
 0x727   : > { %v1125_v53 = vsel %vm1124_vm3, %v2277_v44, %v1121_v51 }
 0x728   : > { %v1127_v54 = vmul.f32 %v1125_v53, %v2691_v57 }
 0x72a   : > { %v1133_v6 = vmul.f32 %v2235_v52, %v1127_v54 }
 0x72c   : > { %v1134_v10 = vpack.c.bf16 %v1133_v6, %v1132_v55 }
 0x72e   : > { %1335 = vmatmul.bf16.vlgmr.msra.gmra.mxu2 %v1134_v10  ;;  %1349 = vmatmul.bf16.vlgmr.msrb.gmra.mxu3 %v1134_v10 }
 0x72f   : > { %1363 = vmatmul.bf16.vlgmr.msra.gmra.mxu0 %v1134_v10  ;;  %1377 = vmatmul.bf16.vlgmr.msrb.gmra.mxu1 %v1134_v10 }
 0x7ac   : > { %v1364_v42 = vpop.f32.mrf.mxu0  ;;  %v1378_v52 = vpop.f32.mrf.mxu1 }
 0x7b1   : > { %v2702_v7 = vpop.f32.mrf.mxu2  ;;  %v2704_v8 = vpop.f32.mrf.mxu3 }
 0x7b2   : > { %v2007_v9 = vmul.f32 -1.442695, %v2702_v7  ;;  %v2008_v2 = vmul.f32 -1.442695, %v2704_v8 }
 0x7b4   : > { %2278 = vpow2.f32 %v2007_v9  ;;  %v1366_v14 = vpop.f32.mrf.mxu0 }
 0x7b5   : > { %2280 = vpow2.f32 %v2008_v2 }
 0x7b9   : > { %v2708_v15 = vpop.f32.mrf.mxu2  ;;  %v2710_v16 = vpop.f32.mrf.mxu3 }
 0x7ba   : > { %v2279_v17 = vpop.eup %2278  ;;  %v2009_v18 = vmul.f32 -1.442695, %v2708_v15  ;;  %v2010_v21 = vmul.f32 -1.442695, %v2710_v16 }
 0x7bb   : > { %v2281_v19 = vpop.eup %2280  ;;  %v1395_v20 = vadd.f32 1.0, %v2279_v17 }
 0x7bc   : > { %v1396_v23 = vadd.f32 1.0, %v2281_v19  ;;  %2282 = vpow2.f32 %v2009_v18 }
 0x7bd   : > { %2284 = vrcp.f32 %v1395_v20  ;;  %v1410_v39 = vand.u32 2147483648, %v1395_v20  ;;  %vm1404_vm5 = vweird.f32 %v1395_v20  ;;  %v1408_v40 = vand.u32 2147483647, %v1395_v20 }
 0x7be   : > { %2286 = vrcp.f32 %v1396_v23  ;;  %v1423_v45 = vand.u32 2147483647, %v1396_v23  ;;  %v1425_v48 = vand.u32 2147483648, %v1396_v23  ;;  %vm1419_vm8 = vweird.f32 %v1396_v23 }
 0x7bf   : > { %2288 = vpow2.f32 %v2010_v21  ;;  %v1411_v50 = vor.u32 1.1754944e-38, %v1410_v39  ;;  %vm1409_vm9 = vcmp.eq.f32.partialorder %v1408_v40, 8.507059e+37  ;;  %v1380_v21 = vpop.f32.mrf.mxu1 }
 0x7c0   : > { %vm1424_vm12 = vcmp.eq.f32.partialorder %v1423_v45, 8.507059e+37  ;;  %v1426_v60 = vor.u32 1.1754944e-38, %v1425_v48 }
 0x7c2   : > { %v2283_v25 = vpop.eup %2282 }
 0x7c3   : > { %v2285_v26 = vpop.eup %2284  ;;  %v1397_v27 = vadd.f32 1.0, %v2283_v25 }
 0x7c4   : > { %v2287_v28 = vpop.eup %2286  ;;  %v1400_v29 = vmul.f32 %v2285_v26, %v1395_v20  ;;  %vm1405_vm4 = vweird.f32 %v2285_v26 }
 0x7c5   : > { %v2289_v30 = vpop.eup %2288  ;;  %v1415_v31 = vmul.f32 %v2287_v28, %v1396_v23  ;;  %2290 = vrcp.f32 %v1397_v27  ;;  %vm2714_vm6 = vmor %vm1404_vm5, %vm1405_vm4  ;;  %vm1420_vm7 = vweird.f32 %v2287_v28  ;;  %v1440_v51 = vand.u32 2147483648, %v1397_v27 }
 0x7c6   : > { %v1401_v32 = vsub.f32 1.0, %v1400_v29  ;;  %v1398_v33 = vadd.f32 1.0, %v2289_v30  ;;  %vm2720_vm10 = vmor %vm1419_vm8, %vm1420_vm7  ;;  %v1438_v55 = vand.u32 2147483647, %v1397_v27  ;;  %vm1434_vm13 = vweird.f32 %v1397_v27 }
 0x7c7   : > { %v1416_v34 = vsub.f32 1.0, %v1415_v31  ;;  %v1441_v63 = vor.u32 1.1754944e-38, %v1440_v51 }
 0x7c8   : > { %v1402_v35 = vmul.f32 %v2285_v26, %v1401_v32  ;;  %2292 = vrcp.f32 %v1398_v33  ;;  %v1455_v62 = vand.u32 2147483648, %v1398_v33  ;;  %v1453_v3 = vand.u32 2147483647, %v1398_v33 }
 0x7c9   : > { %v1417_v36 = vmul.f32 %v2287_v28, %v1416_v34  ;;  %vm1439_vm0 = vcmp.eq.f32.partialorder %v1438_v55, 8.507059e+37  ;;  %vm1449_vm1 = vweird.f32 %v1398_v33 }
 0x7ca   : > { %v1403_v37 = vadd.f32 %v2285_v26, %v1402_v35  ;;  %v1456_v13 = vor.u32 1.1754944e-38, %v1455_v62  ;;  %vm1454_vm3 = vcmp.eq.f32.partialorder %v1453_v3, 8.507059e+37 }
 0x7cb   : > { %v2291_v38 = vpop.eup %2290  ;;  %v1418_v44 = vadd.f32 %v2287_v28, %v1417_v36 }
 0x7cc   : > { %v1430_v41 = vmul.f32 %v2291_v38, %v1397_v27  ;;  %v1407_v47 = vsel %vm2714_vm6, %v2285_v26, %v1403_v37  ;;  %vm1435_vm11 = vweird.f32 %v2291_v38 }
 0x7cd   : > { %v1412_v6 = vsel %vm1409_vm9, %v1411_v50, %v1407_v47  ;;  %v1422_v10 = vsel %vm2720_vm10, %v2287_v28, %v1418_v44  ;;  %vm1436_vm14 = vmor %vm1434_vm13, %vm1435_vm11 }
 0x7ce   : > { %v2293_v46 = vpop.eup %2292  ;;  %v1431_v49 = vsub.f32 1.0, %v1430_v41  ;;  %v1459_v0 = vmul.f32 %v1412_v6, %v2702_v7  ;;  %v1427_v4 = vsel %vm1424_vm12, %v1426_v60, %v1422_v10 }
 0x7cf   : > { %v1445_v11 = vmul.f32 %v2293_v46, %v1398_v33  ;;  %vm1450_vm15 = vweird.f32 %v2293_v46  ;;  %v1460_v58 = vmul.f32 %v1427_v4, %v2704_v8 }
 0x7d0   : > { %v1432_v54 = vmul.f32 %v2291_v38, %v1431_v49  ;;  %vm1451_vm2 = vmor %vm1449_vm1, %vm1450_vm15  ;;  %v1463_v18 = vmul.f32 %v1459_v0, %v1364_v42 }
 0x7d1   : > { %v1446_v59 = vsub.f32 1.0, %v1445_v11  ;;  %v1464_v24 = vmul.f32 %v1460_v58, %v1378_v52 }
 0x7d2   : > { %v1433_v61 = vadd.f32 %v2291_v38, %v1432_v54 }
 0x7d3   : > { %v1447_v1 = vmul.f32 %v2293_v46, %v1446_v59 }
 0x7d4   : > { %v1437_v5 = vsel %vm1436_vm14, %v2291_v38, %v1433_v61 }
 0x7d5   : > { %v1442_v9 = vsel %vm1439_vm0, %v1441_v63, %v1437_v5  ;;  %v1448_v2 = vadd.f32 %v2293_v46, %v1447_v1 }
 0x7d6   : > { %v1461_v12 = vmul.f32 %v1442_v9, %v2708_v15 }
 0x7d7   : > { %v1452_v17 = vsel %vm1451_vm2, %v2293_v46, %v1448_v2 }
 0x7d8   : > { %v1465_v19 = vmul.f32 %v1461_v12, %v1366_v14  ;;  %v1457_v20 = vsel %vm1454_vm3, %v1456_v13, %v1452_v17 }
 0x7d9   : > { %v1462_v7 = vmul.f32 %v1457_v20, %v2710_v16 }
 0x7da   : > { %v1467_v22 = vpack.c.bf16 %v1465_v19, %v1463_v18 }
 0x7db   : > { %v1466_v23 = vmul.f32 %v1462_v7, %v1380_v21 }
 0x7dc   : > { %1605 = vmatmul.bf16.vlgmr.msrb.gmra.mxu2 %v1467_v22 }
 0x7dd   : > { %v1468_v25 = vpack.c.bf16 %v1466_v23, %v1464_v24 }
 0x7df   : > { %1619 = vmatmul.bf16.vlgmr.msra.gmra.mxu3 %v1468_v25 }
 0x85f   : > { %v1606_v15 = vpop.f32.mrf.mxu2 }
 0x862   : > { %v1620_v26 = vpop.f32.mrf.mxu3 }
 0x863   : > { %v1621_v27 = vadd.f32 %v1620_v26, %v1606_v15 }
 0x865   : > { %v1625_v8 = vadd.f32 %v1621_v27, %v2686_v56 }
 0x867   : > { %1627 = vst [vmem:[%s401_s25] sm:$0xff] %v1625_v8  ;;  %v1608_v28 = vpop.f32.mrf.mxu2 }
 0x86a   : > { %v1622_v16 = vpop.f32.mrf.mxu3 }
 0x86b   : > { %v1623_v29 = vadd.f32 %v1622_v16, %v1608_v28 }
 0x86d   : > { %v1626_v30 = vadd.f32 %v1623_v29, %v2691_v57 }
 0x86f   : > { %1628 = vst [vmem:[%s401_s25 + $0x8] sm:$0xff] %v1626_v30 }
 0x870 PF: > { %s22_s30 = sadd.s32 1, %s2432_s30  }
 0x871   : > { %p19_p7 = scmp.ge.s32.totalorder %s22_s30, 4  }
 0x873   :  { %21 = sbr.rel (!%p19_p7) target bundleno = 3 (0x3), region = 103 }
 0x878   :  { %1651 = vsyncpa [#allocation3], 1 }
 0x879   :  { %1653 = vsyncpa [#allocation3 + $0x1], 1 }
 0x87a   :  { %1654 = vsyncpa [#allocation5], 1 }
 0x87b   :  { %1655 = vsyncpa [#allocation8], 1 }

</bundles_post_ra>
